<compile_context>
chip_gen: v7x
topology: tpu7x:2x2x1
jax: 0.10.0
libtpu: 0.0.40
codegen_flags: <defaults>
</compile_context>

<pallas_src>
import functools

import jax
import jax.numpy as jnp
from jax.experimental import pallas as pl
from jax.experimental.pallas import tpu as pltpu

# Original MLP dims (kept natural, no padding).
DIMS = (784, 512, 256, 128, 64, 10)


def mlp_kernel(x_ref,
               w1_ref, b1_ref,
               w2_ref, b2_ref,
               w3_ref, b3_ref,
               w4_ref, b4_ref,
               w5_ref, b5_ref,
               o_ref):
    """Fused 5-layer MLP forward for one (batch_tile, 784) f32 tile.

    Matmuls in bf16 on the MXU with f32 accumulation; bias add + ReLU in f32.
    """
    def layer(h, w_ref, b_ref, relu):
        acc = jnp.dot(h, w_ref[...], preferred_element_type=jnp.float32)
        acc = acc + b_ref[...]
        if relu:
            return jnp.maximum(acc, 0.0).astype(jnp.bfloat16)
        return acc

    h = x_ref[...].astype(jnp.bfloat16)           # f32 -> bf16 cast in-kernel (VPU)
    h = layer(h, w1_ref, b1_ref, True)
    h = layer(h, w2_ref, b2_ref, True)
    h = layer(h, w3_ref, b3_ref, True)
    h = layer(h, w4_ref, b4_ref, True)
    o_ref[...] = layer(h, w5_ref, b5_ref, False)  # f32 (bt, 10) logits


def prepare_params(params):
    """One-time weight prep, hoisted out of the per-call path.

    params: list of 5 (W_t, b) pairs, W_t shape (in, out) (transposed PyTorch
    weight), b shape (1, out).  Returns bf16 weights + f32 (1, out) biases."""
    return [(w.astype(jnp.bfloat16), b.reshape(1, -1).astype(jnp.float32))
            for w, b in params]


def _round_up(a, m):
    return ((a + m - 1) // m) * m


@functools.partial(jax.jit, static_argnames=("batch_tile",))
def net_forward(x, prepped_params, *, batch_tile=512):
    """x: (B, 1, 28, 28) float32 (anything reshapable to (B, 784)).
    prepped_params: output of prepare_params().  Returns f32 logits (B, 10)."""
    B = x.shape[0]
    x2 = x.reshape(B, -1)                          # == x.view(-1, 784)
    assert x2.shape[1] == DIMS[0]
    assert batch_tile % 16 == 0                    # bf16 sublane packing

    # Tile: as large as requested, but small enough that the grid has >= 2
    # steps whenever B > 16 (so the second v7x TensorCore has work).
    bt = max(16, min(batch_tile, _round_up(pl.cdiv(B, 2), 16)))
    n_tiles = pl.cdiv(B, bt)
    B_pad = n_tiles * bt
    if B_pad != B:                                 # batch-axis-only zero pad
        x2 = jnp.pad(x2, ((0, B_pad - B), (0, 0)))

    flat_params = []
    param_specs = []
    for w, b in prepped_params:
        flat_params += [w, b]
        # Full-array blocks, constant index_map -> VMEM-resident across steps.
        # (Could be single-buffered via pipeline_mode=pl.Buffered(1) to save
        #  ~1 MiB on v7x; left at the default for maximum compile portability.)
        param_specs += [pl.BlockSpec(w.shape, lambda i: (0, 0)),
                        pl.BlockSpec(b.shape, lambda i: (0, 0))]

    flops = 2 * B_pad * sum(i * o for i, o in zip(DIMS[:-1], DIMS[1:]))
    bytes_accessed = (B_pad * DIMS[0] * 4
                      + sum(v.size * v.dtype.itemsize for v in flat_params)
                      + B_pad * DIMS[-1] * 4)

    out = pl.pallas_call(
        mlp_kernel,
        out_shape=jax.ShapeDtypeStruct((B_pad, DIMS[-1]), jnp.float32),
        grid_spec=pltpu.PrefetchScalarGridSpec(
            num_scalar_prefetch=0,
            grid=(n_tiles,),
            in_specs=[pl.BlockSpec((bt, DIMS[0]), lambda i: (i, 0))]
                     + param_specs,
            out_specs=pl.BlockSpec((bt, DIMS[-1]), lambda i: (i, 0)),
        ),
        compiler_params=pltpu.CompilerParams(
            dimension_semantics=("parallel",)),
        cost_estimate=pl.CostEstimate(flops=int(flops), transcendentals=0,
                                      bytes_accessed=int(bytes_accessed)),
    )(x2, *flat_params)

    return out if B_pad == B else out[:B]


def init_params(key):
    """Deterministic init mimicking torch.nn.Linear default (U[-1/sqrt(fan_in), +])."""
    params = []
    for fan_in, fan_out in zip(DIMS[:-1], DIMS[1:]):
        key, kw, kb = jax.random.split(key, 3)
        bound = 1.0 / (fan_in ** 0.5)
        # stored pre-transposed: (in, out), so forward computes x @ W_t + b
        w_t = jax.random.uniform(kw, (fan_in, fan_out), jnp.float32, -bound, bound)
        b = jax.random.uniform(kb, (1, fan_out), jnp.float32, -bound, bound)
        params.append((w_t, b))
    return params


def reference_forward(x, params):
    """Pure-JAX reference mirroring the kernel's bf16-matmul / f32-accumulate path."""
    h = x.reshape(x.shape[0], -1)
    for i, (w, b) in enumerate(params):
        h = jnp.dot(h.astype(jnp.bfloat16), w.astype(jnp.bfloat16),
                    preferred_element_type=jnp.float32) + b
        if i < len(params) - 1:
            h = jnp.maximum(h, 0.0).astype(jnp.bfloat16).astype(jnp.float32)
    return h


if __name__ == "__main__":
    key = jax.random.PRNGKey(0)
    key, kx = jax.random.split(key)

    # Small batch, deliberately NOT a multiple of the chosen tile so the
    # batch-pad path and a 2-step grid both get exercised.
    batch = 20
    x = jax.random.normal(kx, (batch, 1, 28, 28), jnp.float32)  # NCHW
    params = init_params(key)
    prepped = prepare_params(params)       # one-time weight cast (hoisted)

    out = net_forward(x, prepped)
    out = jax.block_until_ready(out)

    ref = reference_forward(x, params)
    assert out.shape == (batch, 10), out.shape
    max_err = float(jnp.max(jnp.abs(out - ref)))
    assert jnp.allclose(out, ref, atol=2e-2, rtol=2e-2), max_err

    print("KERNEL_OK")
</pallas_src>

<mosaic_0001>
module attributes {stable_mosaic.version = 11 : i64} {
  func.func @mlp_kernel(%arg0: i32, %arg1: memref<16x784xf32, #tpu.memory_space<vmem>>, %arg2: memref<784x512xbf16, #tpu.memory_space<vmem>>, %arg3: memref<1x512xf32, #tpu.memory_space<vmem>>, %arg4: memref<512x256xbf16, #tpu.memory_space<vmem>>, %arg5: memref<1x256xf32, #tpu.memory_space<vmem>>, %arg6: memref<256x128xbf16, #tpu.memory_space<vmem>>, %arg7: memref<1x128xf32, #tpu.memory_space<vmem>>, %arg8: memref<128x64xbf16, #tpu.memory_space<vmem>>, %arg9: memref<1x64xf32, #tpu.memory_space<vmem>>, %arg10: memref<64x10xbf16, #tpu.memory_space<vmem>>, %arg11: memref<1x10xf32, #tpu.memory_space<vmem>>, %arg12: memref<16x10xf32, #tpu.memory_space<vmem>>) attributes {dimension_semantics = [#tpu.dimension_semantics<parallel>], iteration_bounds = array<i64: 2>, scalar_prefetch = 0 : i64, scratch_operands = 0 : i64, tpu.core_type = #tpu.core_type<tc>, window_params = [{transform_indices = @transform_0, window_bounds = array<i64: 16, 784>}, {pipeline_mode = #tpu.pipeline_mode<synchronous>, transform_indices = @transform_1, window_bounds = array<i64: 784, 512>}, {pipeline_mode = #tpu.pipeline_mode<synchronous>, transform_indices = @transform_2, window_bounds = array<i64: 1, 512>}, {pipeline_mode = #tpu.pipeline_mode<synchronous>, transform_indices = @transform_3, window_bounds = array<i64: 512, 256>}, {pipeline_mode = #tpu.pipeline_mode<synchronous>, transform_indices = @transform_4, window_bounds = array<i64: 1, 256>}, {pipeline_mode = #tpu.pipeline_mode<synchronous>, transform_indices = @transform_5, window_bounds = array<i64: 256, 128>}, {pipeline_mode = #tpu.pipeline_mode<synchronous>, transform_indices = @transform_6, window_bounds = array<i64: 1, 128>}, {pipeline_mode = #tpu.pipeline_mode<synchronous>, transform_indices = @transform_7, window_bounds = array<i64: 128, 64>}, {pipeline_mode = #tpu.pipeline_mode<synchronous>, transform_indices = @transform_8, window_bounds = array<i64: 1, 64>}, {pipeline_mode = #tpu.pipeline_mode<synchronous>, transform_indices = @transform_9, window_bounds = array<i64: 64, 10>}, {pipeline_mode = #tpu.pipeline_mode<synchronous>, transform_indices = @transform_10, window_bounds = array<i64: 1, 10>}, {transform_indices = @transform_11, window_bounds = array<i64: 16, 10>}]} {
    %c0 = arith.constant 0 : index
    %c0_0 = arith.constant 0 : index
    %0 = vector.load %arg1[%c0, %c0_0] : memref<16x784xf32, #tpu.memory_space<vmem>>, vector<16x784xf32>
    %1 = arith.truncf %0 : vector<16x784xf32> to vector<16x784xbf16>
    %c0_1 = arith.constant 0 : index
    %c0_2 = arith.constant 0 : index
    %2 = vector.load %arg2[%c0_1, %c0_2] : memref<784x512xbf16, #tpu.memory_space<vmem>>, vector<784x512xbf16>
    %cst = arith.constant dense<0.000000e+00> : vector<16x512xf32>
    %3 = tpu.matmul %1, %2, %cst {dimension_numbers = #tpu.dot_dimension_numbers<[1], [0], [0], [1], [0, 0, 1, 1], [], []>} : vector<16x784xbf16>, vector<784x512xbf16>, vector<16x512xf32> -> vector<16x512xf32>
    %c0_3 = arith.constant 0 : index
    %c0_4 = arith.constant 0 : index
    %4 = vector.load %arg3[%c0_3, %c0_4] : memref<1x512xf32, #tpu.memory_space<vmem>>, vector<1x512xf32>
    %5 = vector.broadcast %4 : vector<1x512xf32> to vector<16x512xf32>
    %6 = arith.addf %3, %5 : vector<16x512xf32>
    %cst_5 = arith.constant 0.000000e+00 : f32
    %7 = vector.broadcast %cst_5 : f32 to vector<16x512xf32>
    %8 = arith.maximumf %6, %7 : vector<16x512xf32>
    %9 = arith.truncf %8 : vector<16x512xf32> to vector<16x512xbf16>
    %c0_6 = arith.constant 0 : index
    %c0_7 = arith.constant 0 : index
    %10 = vector.load %arg4[%c0_6, %c0_7] : memref<512x256xbf16, #tpu.memory_space<vmem>>, vector<512x256xbf16>
    %cst_8 = arith.constant dense<0.000000e+00> : vector<16x256xf32>
    %11 = tpu.matmul %9, %10, %cst_8 {dimension_numbers = #tpu.dot_dimension_numbers<[1], [0], [0], [1], [0, 0, 1, 1], [], []>} : vector<16x512xbf16>, vector<512x256xbf16>, vector<16x256xf32> -> vector<16x256xf32>
    %c0_9 = arith.constant 0 : index
    %c0_10 = arith.constant 0 : index
    %12 = vector.load %arg5[%c0_9, %c0_10] : memref<1x256xf32, #tpu.memory_space<vmem>>, vector<1x256xf32>
    %13 = vector.broadcast %12 : vector<1x256xf32> to vector<16x256xf32>
    %14 = arith.addf %11, %13 : vector<16x256xf32>
    %cst_11 = arith.constant 0.000000e+00 : f32
    %15 = vector.broadcast %cst_11 : f32 to vector<16x256xf32>
    %16 = arith.maximumf %14, %15 : vector<16x256xf32>
    %17 = arith.truncf %16 : vector<16x256xf32> to vector<16x256xbf16>
    %c0_12 = arith.constant 0 : index
    %c0_13 = arith.constant 0 : index
    %18 = vector.load %arg6[%c0_12, %c0_13] : memref<256x128xbf16, #tpu.memory_space<vmem>>, vector<256x128xbf16>
    %cst_14 = arith.constant dense<0.000000e+00> : vector<16x128xf32>
    %19 = tpu.matmul %17, %18, %cst_14 {dimension_numbers = #tpu.dot_dimension_numbers<[1], [0], [0], [1], [0, 0, 1, 1], [], []>} : vector<16x256xbf16>, vector<256x128xbf16>, vector<16x128xf32> -> vector<16x128xf32>
    %c0_15 = arith.constant 0 : index
    %c0_16 = arith.constant 0 : index
    %20 = vector.load %arg7[%c0_15, %c0_16] : memref<1x128xf32, #tpu.memory_space<vmem>>, vector<1x128xf32>
    %21 = vector.broadcast %20 : vector<1x128xf32> to vector<16x128xf32>
    %22 = arith.addf %19, %21 : vector<16x128xf32>
    %cst_17 = arith.constant 0.000000e+00 : f32
    %23 = vector.broadcast %cst_17 : f32 to vector<16x128xf32>
    %24 = arith.maximumf %22, %23 : vector<16x128xf32>
    %25 = arith.truncf %24 : vector<16x128xf32> to vector<16x128xbf16>
    %c0_18 = arith.constant 0 : index
    %c0_19 = arith.constant 0 : index
    %26 = vector.load %arg8[%c0_18, %c0_19] : memref<128x64xbf16, #tpu.memory_space<vmem>>, vector<128x64xbf16>
    %cst_20 = arith.constant dense<0.000000e+00> : vector<16x64xf32>
    %27 = tpu.matmul %25, %26, %cst_20 {dimension_numbers = #tpu.dot_dimension_numbers<[1], [0], [0], [1], [0, 0, 1, 1], [], []>} : vector<16x128xbf16>, vector<128x64xbf16>, vector<16x64xf32> -> vector<16x64xf32>
    %c0_21 = arith.constant 0 : index
    %c0_22 = arith.constant 0 : index
    %28 = vector.load %arg9[%c0_21, %c0_22] : memref<1x64xf32, #tpu.memory_space<vmem>>, vector<1x64xf32>
    %29 = vector.broadcast %28 : vector<1x64xf32> to vector<16x64xf32>
    %30 = arith.addf %27, %29 : vector<16x64xf32>
    %cst_23 = arith.constant 0.000000e+00 : f32
    %31 = vector.broadcast %cst_23 : f32 to vector<16x64xf32>
    %32 = arith.maximumf %30, %31 : vector<16x64xf32>
    %33 = arith.truncf %32 : vector<16x64xf32> to vector<16x64xbf16>
    %c0_24 = arith.constant 0 : index
    %c0_25 = arith.constant 0 : index
    %34 = vector.load %arg10[%c0_24, %c0_25] : memref<64x10xbf16, #tpu.memory_space<vmem>>, vector<64x10xbf16>
    %cst_26 = arith.constant dense<0.000000e+00> : vector<16x10xf32>
    %35 = tpu.matmul %33, %34, %cst_26 {dimension_numbers = #tpu.dot_dimension_numbers<[1], [0], [0], [1], [0, 0, 1, 1], [], []>} : vector<16x64xbf16>, vector<64x10xbf16>, vector<16x10xf32> -> vector<16x10xf32>
    %c0_27 = arith.constant 0 : index
    %c0_28 = arith.constant 0 : index
    %36 = vector.load %arg11[%c0_27, %c0_28] : memref<1x10xf32, #tpu.memory_space<vmem>>, vector<1x10xf32>
    %37 = vector.broadcast %36 : vector<1x10xf32> to vector<16x10xf32>
    %38 = arith.addf %35, %37 : vector<16x10xf32>
    %c0_29 = arith.constant 0 : index
    %c0_30 = arith.constant 0 : index
    %39 = vector.load %arg12[%c0_29, %c0_30] : memref<16x10xf32, #tpu.memory_space<vmem>>, vector<16x10xf32>
    tpu.vector_store %arg12[%c0_29, %c0_30], %38 {strides = array<i32>} : memref<16x10xf32, #tpu.memory_space<vmem>>, vector<16x10xf32>,
    return
  }
  func.func @transform_0(%arg0: i32) -> (i32, i32) {
    %c0_i32 = arith.constant 0 : i32
    %c0_i32_0 = arith.constant 0 : i32
    return %arg0, %c0_i32 : i32, i32
  }
  func.func @transform_1(%arg0: i32) -> (i32, i32) {
    %c0_i32 = arith.constant 0 : i32
    %c0_i32_0 = arith.constant 0 : i32
    %c0_i32_1 = arith.constant 0 : i32
    return %c0_i32, %c0_i32_0 : i32, i32
  }
  func.func @transform_2(%arg0: i32) -> (i32, i32) {
    %c0_i32 = arith.constant 0 : i32
    %c0_i32_0 = arith.constant 0 : i32
    %c0_i32_1 = arith.constant 0 : i32
    return %c0_i32, %c0_i32_0 : i32, i32
  }
  func.func @transform_3(%arg0: i32) -> (i32, i32) {
    %c0_i32 = arith.constant 0 : i32
    %c0_i32_0 = arith.constant 0 : i32
    %c0_i32_1 = arith.constant 0 : i32
    return %c0_i32, %c0_i32_0 : i32, i32
  }
  func.func @transform_4(%arg0: i32) -> (i32, i32) {
    %c0_i32 = arith.constant 0 : i32
    %c0_i32_0 = arith.constant 0 : i32
    %c0_i32_1 = arith.constant 0 : i32
    return %c0_i32, %c0_i32_0 : i32, i32
  }
  func.func @transform_5(%arg0: i32) -> (i32, i32) {
    %c0_i32 = arith.constant 0 : i32
    %c0_i32_0 = arith.constant 0 : i32
    %c0_i32_1 = arith.constant 0 : i32
    return %c0_i32, %c0_i32_0 : i32, i32
  }
  func.func @transform_6(%arg0: i32) -> (i32, i32) {
    %c0_i32 = arith.constant 0 : i32
    %c0_i32_0 = arith.constant 0 : i32
    %c0_i32_1 = arith.constant 0 : i32
    return %c0_i32, %c0_i32_0 : i32, i32
  }
  func.func @transform_7(%arg0: i32) -> (i32, i32) {
    %c0_i32 = arith.constant 0 : i32
    %c0_i32_0 = arith.constant 0 : i32
    %c0_i32_1 = arith.constant 0 : i32
    return %c0_i32, %c0_i32_0 : i32, i32
  }
  func.func @transform_8(%arg0: i32) -> (i32, i32) {
    %c0_i32 = arith.constant 0 : i32
    %c0_i32_0 = arith.constant 0 : i32
    %c0_i32_1 = arith.constant 0 : i32
    return %c0_i32, %c0_i32_0 : i32, i32
  }
  func.func @transform_9(%arg0: i32) -> (i32, i32) {
    %c0_i32 = arith.constant 0 : i32
    %c0_i32_0 = arith.constant 0 : i32
    %c0_i32_1 = arith.constant 0 : i32
    return %c0_i32, %c0_i32_0 : i32, i32
  }
  func.func @transform_10(%arg0: i32) -> (i32, i32) {
    %c0_i32 = arith.constant 0 : i32
    %c0_i32_0 = arith.constant 0 : i32
    %c0_i32_1 = arith.constant 0 : i32
    return %c0_i32, %c0_i32_0 : i32, i32
  }
  func.func @transform_11(%arg0: i32) -> (i32, i32) {
    %c0_i32 = arith.constant 0 : i32
    %c0_i32_0 = arith.constant 0 : i32
    return %arg0, %c0_i32 : i32, i32
  }
}

</mosaic_0001>

<bundles_post_ra>
// kernel: net_forward.1
= control target key start
LH: loop header
LB: loop body
LE: loop exit
PB: predicated region body
PF: predicated region fallthrough
CT: control target
= control target key end

     0   :  { %s3812_s17 = smov 0   ;;  %s4778_s0 = inlined_call_operand.vmem [shape: f32[32,784], index: 0, kind: input, shape index: {}]   ;;  %s4779_s1 = inlined_call_operand.vmem [shape: bf16[784,512], index: 1, kind: input, shape index: {}]   ;;  %s4780_s2 = inlined_call_operand.vmem [shape: f32[1,512], index: 2, kind: input, shape index: {}]   ;;  %s4781_s3 = inlined_call_operand.vmem [shape: bf16[512,256], index: 3, kind: input, shape index: {}]   ;;  %s4782_s4 = inlined_call_operand.vmem [shape: f32[1,256], index: 4, kind: input, shape index: {}]   ;;  %s4783_s5 = inlined_call_operand.vmem [shape: bf16[256,128], index: 5, kind: input, shape index: {}]   ;;  %s4784_s6 = inlined_call_operand.vmem [shape: f32[1,128], index: 6, kind: input, shape index: {}]   ;;  %s4785_s7 = inlined_call_operand.vmem [shape: bf16[128,64], index: 7, kind: input, shape index: {}]   ;;  %s4786_s8 = inlined_call_operand.vmem [shape: f32[1,64], index: 8, kind: input, shape index: {}]   ;;  %s4787_s9 = inlined_call_operand.vmem [shape: bf16[64,10], index: 9, kind: input, shape index: {}]   ;;  %s4788_s10 = inlined_call_operand.vmem [shape: f32[1,10], index: 10, kind: input, shape index: {}]   ;;  %s4789_s11 = inlined_call_operand.vmem [shape: f32[32,10], index: 11, kind: output, shape index: {}]  }
   0x1 LB: > { %s2898_s18 = sadd.s32 4294967295, %s3747_s17   ;;  %p2902_p0 = scmp.ge.s32.totalorder %s3747_s17, 1  ;;  %s3747_s17 = sphi %s3812_s17, %s21_s17  }
   0x2   : > { %p339_p1 = scmp.lt.s32.totalorder %s3747_s17, 3 }
   0x4   : > { %p340_p2 = pnand %p2902_p0, %p339_p1 }
   0x5   : > { %v3323_v0 = vld [vmem:[%s4779_s1 + $0x4] ss:$16 sps:$4 sm:$0xff] (!%p340_p2)   ;;  %s2903_s21 = sshll.u32 (!%p340_p2), %s2898_s18, 1  ;;  %v3325_v1 = vld [vmem:[%s4779_s1] ss:$16 sps:$4 sm:$0xff] (!%p340_p2)   ;;  %v3749_v2 = vmov (!%p340_p2), 0  }
   0x6   : > { %343 = sbr.rel (%p340_p2) target bundleno = 1368 (0x558), region = 64  ;;  %1778 = vmatprep.mubr.bf16.mxu1 (!%p340_p2), %v3749_v2  ;;  %p381_p3 = scmp.lt.s32.totalorder (!%p340_p2), %s2903_s21, 3  ;;  %1617 = vmatprep.subr.bf16.mxu0 (!%p340_p2), %v3323_v0  ;;  %v3326_v3 = vld [vmem:[%s4779_s1 + $0x604] ss:$16 sps:$4 sm:$0xff] (!%p340_p2)   ;;  %v3330_v5 = vld [vmem:[%s4779_s1 + $0x600] ss:$16 sps:$4 sm:$0xff] (!%p340_p2)  }
   0x7   : > { %1618 = vmatpush1.bf16.msra.mxu0 (!%p340_p2), %v3325_v1  ;;  %v3328_v4 = vld [vmem:[%s4779_s1 + $0x24] ss:$16 sps:$4 sm:$0xff] (!%p340_p2)   ;;  %v3331_v6 = vld [vmem:[%s4779_s1 + $0x20] ss:$16 sps:$4 sm:$0xff] (!%p340_p2)   ;;  %1746 = vmatprep.subr.bf16.mxu1 (!%p340_p2), %v3326_v3  ;;  %v3334_v7 = vld [vmem:[%s4779_s1 + $0xc] ss:$16 sps:$4 sm:$0xff] (!%p340_p2)  }
   0x8   : > { %1619 = vmatprep.subr.bf16.mxu0 (!%p340_p2), %v3328_v4  ;;  %1747 = vmatpush1.bf16.msra.mxu1 (!%p340_p2), %v3330_v5  ;;  %v3335_v8 = vld [vmem:[%s4779_s1 + $0x44] ss:$16 sps:$4 sm:$0xff] (!%p340_p2)   ;;  %v3337_v9 = vld [vmem:[%s4779_s1 + $0x40] ss:$16 sps:$4 sm:$0xff] (!%p340_p2)   ;;  %v3332_v11 = vld [vmem:[%s4779_s1 + $0x8] ss:$16 sps:$4 sm:$0xff] (!%p340_p2)  }
   0x9   : > { %1789 = vmatprep.subr.bf16.mxu1 (!%p340_p2), %v3334_v7  ;;  %v3341_v10 = vld [vmem:[%s4779_s1 + $0x64] ss:$16 sps:$4 sm:$0xff] (!%p340_p2)   ;;  %vm1613_vm0 = vcmask (!%p340_p2), 130048   ;;  %v3340_v15 = vld [vmem:[%s4779_s1 + $0x2c] ss:$16 sps:$4 sm:$0xff] (!%p340_p2)   ;;  %vm3751_vm1 = vmmov (!%p340_p2), 0  }
   0xa   : > { %v3343_v16 = vld [vmem:[%s4779_s1 + $0x60] ss:$16 sps:$4 sm:$0xff] (!%p340_p2)   ;;  %v3347_v17 = vld [vmem:[%s4779_s1 + $0x84] ss:$16 sps:$4 sm:$0xff] (!%p340_p2)   ;;  %v3338_v18 = vld [vmem:[%s4779_s1 + $0x28] ss:$16 sps:$4 sm:$0xff] (!%p340_p2)  }
   0xb   : > { %1620 = vmatpush1.bf16.msra.mxu0 (!%p340_p2), %v3331_v6  ;;  %v3346_v19 = vld [vmem:[%s4779_s1 + $0x4c] ss:$16 sps:$4 sm:$0xff] (!%p340_p2)   ;;  %v3349_v20 = vld [vmem:[%s4779_s1 + $0x80] ss:$16 sps:$4 sm:$0xff] (!%p340_p2)   ;;  %v3353_v21 = vld [vmem:[%s4779_s1 + $0xa4] ss:$16 sps:$4 sm:$0xff] (!%p340_p2)  }
   0xc   : > { %1621 = vmatprep.subr.bf16.mxu0 (!%p340_p2), %v3335_v8  ;;  %v3344_v22 = vld [vmem:[%s4779_s1 + $0x48] ss:$16 sps:$4 sm:$0xff] (!%p340_p2)   ;;  %v3352_v23 = vld [vmem:[%s4779_s1 + $0x6c] ss:$16 sps:$4 sm:$0xff] (!%p340_p2)   ;;  %v3355_v24 = vld [vmem:[%s4779_s1 + $0xa0] ss:$16 sps:$4 sm:$0xff] (!%p340_p2)  }
   0xd   : > { %s4791_s21 = smov (!%p381_p3, %s2903_s21), 3  ;;  %v3359_v25 = vld [vmem:[%s4779_s1 + $0xc4] ss:$16 sps:$4 sm:$0xff]   ;;  %v3350_v26 = vld [vmem:[%s4779_s1 + $0x68] ss:$16 sps:$4 sm:$0xff]   ;;  %vm2794_vm2 = vcmask 523264  }
   0xe   : > { %s3311_s18 = smul.u32 56, %s4791_s21  ;;  %v3358_v27 = vld [vmem:[%s4779_s1 + $0x8c] ss:$16 sps:$4 sm:$0xff]   ;;  %v3361_v28 = vld [vmem:[%s4779_s1 + $0xc0] ss:$16 sps:$4 sm:$0xff]   ;;  %s2906_s16 = sshll.u32 %s4791_s21, 3 }
   0xf   : > { %1622 = vmatpush1.bf16.msra.mxu0 %v3337_v9  ;;  %v3365_v29 = vld [vmem:[%s4779_s1 + $0xe4] ss:$16 sps:$4 sm:$0xff]   ;;  %v3356_v30 = vld [vmem:[%s4779_s1 + $0x88] ss:$16 sps:$4 sm:$0xff]   ;;  %v3364_v31 = vld [vmem:[%s4779_s1 + $0xac] ss:$16 sps:$4 sm:$0xff]   ;;  %s391_s23 = scalar_lea.vmem %s4789_s11, %s2906_s16 }
  0x10   : > { %s3854_s24 = scalar_lea.vmem %s4778_s0, %s3311_s18  ;;  %1623 = vmatprep.subr.bf16.mxu0 %v3341_v10  ;;  %v3367_v32 = vld [vmem:[%s4779_s1 + $0xe0] ss:$16 sps:$4 sm:$0xff]   ;;  %v3371_v33 = vld [vmem:[%s4779_s1 + $0x104] ss:$16 sps:$4 sm:$0xff]   ;;  %v3362_v34 = vld [vmem:[%s4779_s1 + $0xa8] ss:$16 sps:$4 sm:$0xff]  }
  0x11   : > { %v400_v12 = vld [vmem:[%s3854_s24 + $0x30] sm:$0xff]  ;;  %v407_v13 = vld [vmem:[%s3854_s24 + $0x68] sm:$0xff]  ;;  %v402_v50 = vld [vmem:[%s3854_s24 + $0x40] sm:$0xff]  ;;  %vm2839_vm3 = vcmask 80896  }
  0x12   : > { %v3864_v14 = vpack.c.bf16 %v407_v13, %v400_v12  ;;  %v3370_v35 = vld [vmem:[%s4779_s1 + $0xcc] ss:$16 sps:$4 sm:$0xff]   ;;  %v3373_v36 = vld [vmem:[%s4779_s1 + $0x100] ss:$16 sps:$4 sm:$0xff]   ;;  %v3377_v37 = vld [vmem:[%s4779_s1 + $0x124] ss:$16 sps:$4 sm:$0xff]  }
  0x13   : > { %1624 = vmatpush1.bf16.msra.mxu0 %v3343_v16  ;;  %v3368_v38 = vld [vmem:[%s4779_s1 + $0xc8] ss:$16 sps:$4 sm:$0xff]   ;;  %v3376_v39 = vld [vmem:[%s4779_s1 + $0xec] ss:$16 sps:$4 sm:$0xff]   ;;  %v3379_v40 = vld [vmem:[%s4779_s1 + $0x120] ss:$16 sps:$4 sm:$0xff]  }
  0x14   : > { %3103 = vmatmul.mubr.msk.bf16.vlgmr.msra.gmra.mrb[0].mxu1 %vm1613_vm0, %v3864_v14  ;;  %1625 = vmatprep.subr.bf16.mxu0 %v3347_v17  ;;  %v3383_v41 = vld [vmem:[%s4779_s1 + $0x144] ss:$16 sps:$4 sm:$0xff]   ;;  %v3374_v42 = vld [vmem:[%s4779_s1 + $0xe8] ss:$16 sps:$4 sm:$0xff]   ;;  %v3382_v43 = vld [vmem:[%s4779_s1 + $0x10c] ss:$16 sps:$4 sm:$0xff]  }
  0x15   : > { %1790 = vmatpush1.bf16.msra.mxu1 %v3332_v11  ;;  %v3385_v44 = vld [vmem:[%s4779_s1 + $0x140] ss:$16 sps:$4 sm:$0xff]   ;;  %v3389_v45 = vld [vmem:[%s4779_s1 + $0x164] ss:$16 sps:$4 sm:$0xff]   ;;  %v3380_v46 = vld [vmem:[%s4779_s1 + $0x108] ss:$16 sps:$4 sm:$0xff]  }
  0x16   : > { %1791 = vmatprep.subr.bf16.mxu1 %v3340_v15  ;;  %v3388_v47 = vld [vmem:[%s4779_s1 + $0x12c] ss:$16 sps:$4 sm:$0xff]   ;;  %v3391_v48 = vld [vmem:[%s4779_s1 + $0x160] ss:$16 sps:$4 sm:$0xff]   ;;  %v3395_v51 = vld [vmem:[%s4779_s1 + $0x184] ss:$16 sps:$4 sm:$0xff]  }
  0x17   : > { %1626 = vmatpush1.bf16.msra.mxu0 %v3349_v20  ;;  %v395_v49 = vld [vmem:[%s3854_s24 + $0x8] sm:$0xff]  ;;  %v3397_v55 = vld [vmem:[%s4779_s1 + $0x180] ss:$16 sps:$4 sm:$0xff]   ;;  %v3401_v56 = vld [vmem:[%s4779_s1 + $0x1a4] ss:$16 sps:$4 sm:$0xff]  }
  0x18   : > { %1627 = vmatprep.subr.bf16.mxu0 %v3353_v21  ;;  %v409_v52 = vpack.c.bf16 %v402_v50, %v395_v49  ;;  %v3386_v53 = vld [vmem:[%s4779_s1 + $0x128] ss:$16 sps:$4 sm:$0xff]   ;;  %v3394_v54 = vld [vmem:[%s4779_s1 + $0x14c] ss:$16 sps:$4 sm:$0xff]   ;;  %v3403_v59 = vld [vmem:[%s4779_s1 + $0x1a0] ss:$16 sps:$4 sm:$0xff]  }
  0x19   : > { %1792 = vmatpush1.bf16.msra.mxu1 %v3338_v18  ;;  %v3392_v57 = vld [vmem:[%s4779_s1 + $0x148] ss:$16 sps:$4 sm:$0xff]   ;;  %v3400_v58 = vld [vmem:[%s4779_s1 + $0x16c] ss:$16 sps:$4 sm:$0xff]   ;;  %v3407_v60 = vld [vmem:[%s4779_s1 + $0x1c4] ss:$16 sps:$4 sm:$0xff]  }
  0x1a   : > { %1793 = vmatprep.subr.bf16.mxu1 %v3346_v19  ;;  %1649 = vmatprep.mubr.bf16.mxu0 %v409_v52  ;;  %v3398_v61 = vld [vmem:[%s4779_s1 + $0x168] ss:$16 sps:$4 sm:$0xff]   ;;  %v3406_v62 = vld [vmem:[%s4779_s1 + $0x18c] ss:$16 sps:$4 sm:$0xff]   ;;  %v3409_v63 = vld [vmem:[%s4779_s1 + $0x1c0] ss:$16 sps:$4 sm:$0xff]  }
  0x1b   : > { %1628 = vmatpush1.bf16.msra.mxu0 %v3355_v24  ;;  %1821 = vmatprep.mubr.bf16.mxu1 %v409_v52  ;;  %v3404_v0 = vld [vmem:[%s4779_s1 + $0x188] ss:$16 sps:$4 sm:$0xff]   ;;  %v3413_v1 = vld [vmem:[%s4779_s1 + $0x1e4] ss:$16 sps:$4 sm:$0xff]   ;;  %v3412_v3 = vld [vmem:[%s4779_s1 + $0x1ac] ss:$16 sps:$4 sm:$0xff]  }
  0x1c   : > { %1629 = vmatprep.subr.bf16.mxu0 %v3359_v25  ;;  %v3415_v4 = vld [vmem:[%s4779_s1 + $0x1e0] ss:$16 sps:$4 sm:$0xff]   ;;  %v401_v6 = vld [vmem:[%s3854_s24 + $0x38] sm:$0xff]  ;;  %v3421_v7 = vld [vmem:[%s4779_s1 + $0x204] ss:$16 sps:$4 sm:$0xff]  }
  0x1d   : > { %1794 = vmatpush1.bf16.msra.mxu1 %v3344_v22  ;;  %v394_v5 = vld [vmem:[%s3854_s24] sm:$0xff]  ;;  %v3410_v8 = vld [vmem:[%s4779_s1 + $0x1a8] ss:$16 sps:$4 sm:$0xff]   ;;  %v3418_v9 = vld [vmem:[%s4779_s1 + $0x1cc] ss:$16 sps:$4 sm:$0xff]  }
  0x1e   : > { %1795 = vmatprep.subr.bf16.mxu1 %v3352_v23  ;;  %v408_v10 = vpack.c.bf16 %v401_v6, %v394_v5  ;;  %v3419_v11 = vld [vmem:[%s4779_s1 + $0x200] ss:$16 sps:$4 sm:$0xff]   ;;  %v3427_v12 = vld [vmem:[%s4779_s1 + $0x224] ss:$16 sps:$4 sm:$0xff]   ;;  %v3416_v13 = vld [vmem:[%s4779_s1 + $0x1c8] ss:$16 sps:$4 sm:$0xff]  }
  0x1f   : > { %1630 = vmatpush1.bf16.msra.mxu0 %v3361_v28  ;;  %v3424_v15 = vld [vmem:[%s4779_s1 + $0x1ec] ss:$16 sps:$4 sm:$0xff]   ;;  %v3425_v16 = vld [vmem:[%s4779_s1 + $0x220] ss:$16 sps:$4 sm:$0xff]   ;;  %v3433_v17 = vld [vmem:[%s4779_s1 + $0x244] ss:$16 sps:$4 sm:$0xff]  }
  0x20   : > { %1631 = vmatprep.subr.bf16.mxu0 %v3365_v29  ;;  %v3422_v18 = vld [vmem:[%s4779_s1 + $0x1e8] ss:$16 sps:$4 sm:$0xff]   ;;  %v3430_v19 = vld [vmem:[%s4779_s1 + $0x20c] ss:$16 sps:$4 sm:$0xff]   ;;  %v3431_v20 = vld [vmem:[%s4779_s1 + $0x240] ss:$16 sps:$4 sm:$0xff]  }
  0x21   : > { %1796 = vmatpush1.bf16.msra.mxu1 %v3350_v26  ;;  %v3439_v21 = vld [vmem:[%s4779_s1 + $0x264] ss:$16 sps:$4 sm:$0xff]   ;;  %v3428_v22 = vld [vmem:[%s4779_s1 + $0x208] ss:$16 sps:$4 sm:$0xff]   ;;  %v3436_v23 = vld [vmem:[%s4779_s1 + $0x22c] ss:$16 sps:$4 sm:$0xff]  }
  0x22   : > { %1797 = vmatprep.subr.bf16.mxu1 %v3358_v27  ;;  %v3437_v24 = vld [vmem:[%s4779_s1 + $0x260] ss:$16 sps:$4 sm:$0xff]   ;;  %v3445_v25 = vld [vmem:[%s4779_s1 + $0x284] ss:$16 sps:$4 sm:$0xff]   ;;  %v3434_v26 = vld [vmem:[%s4779_s1 + $0x228] ss:$16 sps:$4 sm:$0xff]  }
  0x23   : > { %1632 = vmatpush1.bf16.msra.mxu0 %v3367_v32  ;;  %v3442_v27 = vld [vmem:[%s4779_s1 + $0x24c] ss:$16 sps:$4 sm:$0xff]   ;;  %v3443_v28 = vld [vmem:[%s4779_s1 + $0x280] ss:$16 sps:$4 sm:$0xff]   ;;  %v3451_v29 = vld [vmem:[%s4779_s1 + $0x2a4] ss:$16 sps:$4 sm:$0xff]  }
  0x24   : > { %1633 = vmatprep.subr.bf16.mxu0 %v3371_v33  ;;  %v3449_v32 = vld [vmem:[%s4779_s1 + $0x2a0] ss:$16 sps:$4 sm:$0xff]   ;;  %v3457_v33 = vld [vmem:[%s4779_s1 + $0x2c4] ss:$16 sps:$4 sm:$0xff]   ;;  %v3464_v49 = vld [vmem:[%s4779_s1 + $0x2c8] ss:$16 sps:$4 sm:$0xff]  }
  0x25   : > { %1798 = vmatpush1.bf16.msra.mxu1 %v3356_v30  ;;  %v3440_v30 = vld [vmem:[%s4779_s1 + $0x248] ss:$16 sps:$4 sm:$0xff]   ;;  %v3472_v50 = vld [vmem:[%s4779_s1 + $0x2ec] ss:$16 sps:$4 sm:$0xff]   ;;  %v3481_v52 = vld [vmem:[%s4779_s1 + $0x344] ss:$16 sps:$4 sm:$0xff]  }
  0x26   : > { %1799 = vmatprep.subr.bf16.mxu1 %v3364_v31  ;;  %v3448_v31 = vld [vmem:[%s4779_s1 + $0x26c] ss:$16 sps:$4 sm:$0xff]   ;;  %v3505_v5 = vld [vmem:[%s4779_s1 + $0x3c4] ss:$16 sps:$4 sm:$0xff]   ;;  %v3494_v6 = vld [vmem:[%s4779_s1 + $0x368] ss:$16 sps:$4 sm:$0xff]  }
  0x27   : > { %1634 = vmatpush1.bf16.msra.mxu0 %v3373_v36  ;;  %v3455_v36 = vld [vmem:[%s4779_s1 + $0x2c0] ss:$16 sps:$4 sm:$0xff]  }
  0x28   : > { %1635 = vmatprep.subr.bf16.mxu0 %v3377_v37  ;;  %v397_v37 = vld [vmem:[%s3854_s24 + $0x18] sm:$0xff] }
  0x29   : > { %1800 = vmatpush1.bf16.msra.mxu1 %v3362_v34  ;;  %v3446_v34 = vld [vmem:[%s4779_s1 + $0x268] ss:$16 sps:$4 sm:$0xff]  }
  0x2a   : > { %1801 = vmatprep.subr.bf16.mxu1 %v3370_v35  ;;  %v3454_v35 = vld [vmem:[%s4779_s1 + $0x28c] ss:$16 sps:$4 sm:$0xff]  }
  0x2b   : > { %1636 = vmatpush1.bf16.msra.mxu0 %v3379_v40 }
  0x2c   : > { %1637 = vmatprep.subr.bf16.mxu0 %v3383_v41  ;;  %v3452_v41 = vld [vmem:[%s4779_s1 + $0x288] ss:$16 sps:$4 sm:$0xff]  }
  0x2d   : > { %1802 = vmatpush1.bf16.msra.mxu1 %v3368_v38  ;;  %v404_v38 = vld [vmem:[%s3854_s24 + $0x50] sm:$0xff] }
  0x2e   : > { %1803 = vmatprep.subr.bf16.mxu1 %v3376_v39  ;;  %v3463_v39 = vld [vmem:[%s4779_s1 + $0x2e4] ss:$16 sps:$4 sm:$0xff]   ;;  %v411_v40 = vpack.c.bf16 %v404_v38, %v397_v37  ;;  %v3530_v37 = vld [vmem:[%s4779_s1 + $0x428] ss:$16 sps:$4 sm:$0xff]   ;;  %v3538_v38 = vld [vmem:[%s4779_s1 + $0x44c] ss:$16 sps:$4 sm:$0xff]  }
  0x2f   : > { %1638 = vmatpush1.bf16.msra.mxu0 %v3385_v44  ;;  %v3469_v44 = vld [vmem:[%s4779_s1 + $0x304] ss:$16 sps:$4 sm:$0xff]  }
  0x30   : > { %1639 = vmatprep.subr.bf16.mxu0 %v3389_v45  ;;  %v3458_v45 = vld [vmem:[%s4779_s1 + $0x2a8] ss:$16 sps:$4 sm:$0xff]  }
  0x31   : > { %1804 = vmatpush1.bf16.msra.mxu1 %v3374_v42  ;;  %v3460_v42 = vld [vmem:[%s4779_s1 + $0x2ac] ss:$16 sps:$4 sm:$0xff]  }
  0x32   : > { %1805 = vmatprep.subr.bf16.mxu1 %v3382_v43  ;;  %v3461_v43 = vld [vmem:[%s4779_s1 + $0x2e0] ss:$16 sps:$4 sm:$0xff]  }
  0x33   : > { %1640 = vmatpush1.bf16.msra.mxu0 %v3391_v48  ;;  %v3475_v48 = vld [vmem:[%s4779_s1 + $0x324] ss:$16 sps:$4 sm:$0xff]  }
  0x34   : > { %1641 = vmatprep.subr.bf16.mxu0 %v3395_v51  ;;  %v3473_v51 = vld [vmem:[%s4779_s1 + $0x320] ss:$16 sps:$4 sm:$0xff]  }
  0x35   : > { %1806 = vmatpush1.bf16.msra.mxu1 %v3380_v46  ;;  %v3466_v46 = vld [vmem:[%s4779_s1 + $0x2cc] ss:$16 sps:$4 sm:$0xff]  }
  0x36   : > { %1807 = vmatprep.subr.bf16.mxu1 %v3388_v47  ;;  %v3467_v47 = vld [vmem:[%s4779_s1 + $0x300] ss:$16 sps:$4 sm:$0xff]  }
  0x37   : > { %1642 = vmatpush1.bf16.msra.mxu0 %v3397_v55  ;;  %v3479_v55 = vld [vmem:[%s4779_s1 + $0x340] ss:$16 sps:$4 sm:$0xff]  }
  0x38   : > { %1643 = vmatprep.subr.bf16.mxu0 %v3401_v56  ;;  %v3487_v56 = vld [vmem:[%s4779_s1 + $0x364] ss:$16 sps:$4 sm:$0xff]  }
  0x39   : > { %1808 = vmatpush1.bf16.msra.mxu1 %v3386_v53  ;;  %v3470_v53 = vld [vmem:[%s4779_s1 + $0x2e8] ss:$16 sps:$4 sm:$0xff]  }
  0x3a   : > { %1809 = vmatprep.subr.bf16.mxu1 %v3394_v54  ;;  %v3478_v54 = vld [vmem:[%s4779_s1 + $0x30c] ss:$16 sps:$4 sm:$0xff]  }
  0x3b   : > { %1644 = vmatpush1.bf16.msra.mxu0 %v3403_v59  ;;  %v3485_v59 = vld [vmem:[%s4779_s1 + $0x360] ss:$16 sps:$4 sm:$0xff]  }
  0x3c   : > { %1645 = vmatprep.subr.bf16.mxu0 %v3407_v60  ;;  %v3493_v60 = vld [vmem:[%s4779_s1 + $0x384] ss:$16 sps:$4 sm:$0xff]  }
  0x3d   : > { %1810 = vmatpush1.bf16.msra.mxu1 %v3392_v57  ;;  %v3476_v57 = vld [vmem:[%s4779_s1 + $0x308] ss:$16 sps:$4 sm:$0xff]  }
  0x3e   : > { %1811 = vmatprep.subr.bf16.mxu1 %v3400_v58  ;;  %v3484_v58 = vld [vmem:[%s4779_s1 + $0x32c] ss:$16 sps:$4 sm:$0xff]  }
  0x3f   : > { %1646 = vmatpush1.bf16.msra.mxu0 %v3409_v63  ;;  %v3491_v63 = vld [vmem:[%s4779_s1 + $0x380] ss:$16 sps:$4 sm:$0xff]  }
  0x40   : > { %1647 = vmatprep.subr.bf16.mxu0 %v3413_v1  ;;  %v3488_v1 = vld [vmem:[%s4779_s1 + $0x348] ss:$16 sps:$4 sm:$0xff]  }
  0x41   : > { %1812 = vmatpush1.bf16.msra.mxu1 %v3398_v61  ;;  %v3482_v61 = vld [vmem:[%s4779_s1 + $0x328] ss:$16 sps:$4 sm:$0xff]  }
  0x42   : > { %1813 = vmatprep.subr.bf16.mxu1 %v3406_v62  ;;  %v3490_v62 = vld [vmem:[%s4779_s1 + $0x34c] ss:$16 sps:$4 sm:$0xff]  }
  0x43   : > { %1648 = vmatpush1.bf16.msra.mxu0 %v3415_v4  ;;  %v3497_v4 = vld [vmem:[%s4779_s1 + $0x3a0] ss:$16 sps:$4 sm:$0xff]  }
  0x44   : > { %1660 = vmatprep.subr.bf16.mxu0 %v3421_v7  ;;  %v3502_v7 = vld [vmem:[%s4779_s1 + $0x38c] ss:$16 sps:$4 sm:$0xff]  }
  0x45   : > { %1814 = vmatpush1.bf16.msra.mxu1 %v3404_v0  ;;  %v3499_v0 = vld [vmem:[%s4779_s1 + $0x3a4] ss:$16 sps:$4 sm:$0xff]  }
  0x46   : > { %1815 = vmatprep.subr.bf16.mxu1 %v3412_v3  ;;  %1650 = vmatmul.mubr.bf16.vlgmr.msra.gmra.mrb[0].mxu0 %v408_v10  ;;  %v3496_v3 = vld [vmem:[%s4779_s1 + $0x36c] ss:$16 sps:$4 sm:$0xff]  }
  0x47   : > { %1661 = vmatpush1.bf16.msra.mxu0 %v3419_v11  ;;  %1692 = vmatprep.mubr.bf16.mxu0 %v411_v40  ;;  %v3508_v11 = vld [vmem:[%s4779_s1 + $0x3ac] ss:$16 sps:$4 sm:$0xff]  }
  0x48   : > { %1662 = vmatprep.subr.bf16.mxu0 %v3427_v12  ;;  %v3509_v12 = vld [vmem:[%s4779_s1 + $0x3e0] ss:$16 sps:$4 sm:$0xff]  }
  0x49   : > { %1816 = vmatpush1.bf16.msra.mxu1 %v3410_v8  ;;  %v3503_v8 = vld [vmem:[%s4779_s1 + $0x3c0] ss:$16 sps:$4 sm:$0xff]  }
  0x4a   : > { %1817 = vmatprep.subr.bf16.mxu1 %v3418_v9  ;;  %v3500_v9 = vld [vmem:[%s4779_s1 + $0x388] ss:$16 sps:$4 sm:$0xff]  }
  0x4b   : > { %1663 = vmatpush1.bf16.msra.mxu0 %v3425_v16  ;;  %v3517_v16 = vld [vmem:[%s4779_s1 + $0x404] ss:$16 sps:$4 sm:$0xff]  }
  0x4c   : > { %1664 = vmatprep.subr.bf16.mxu0 %v3433_v17  ;;  %v3506_v17 = vld [vmem:[%s4779_s1 + $0x3a8] ss:$16 sps:$4 sm:$0xff]  }
  0x4d   : > { %1818 = vmatpush1.bf16.msra.mxu1 %v3416_v13  ;;  %v396_v13 = vld [vmem:[%s3854_s24 + $0x10] sm:$0xff] }
  0x4e   : > { %1819 = vmatprep.subr.bf16.mxu1 %v3424_v15  ;;  %v403_v15 = vld [vmem:[%s3854_s24 + $0x48] sm:$0xff] }
  0x4f   : > { %1665 = vmatpush1.bf16.msra.mxu0 %v3431_v20  ;;  %v3515_v20 = vld [vmem:[%s4779_s1 + $0x400] ss:$16 sps:$4 sm:$0xff]  }
  0x50   : > { %1666 = vmatprep.subr.bf16.mxu0 %v3439_v21  ;;  %v3523_v21 = vld [vmem:[%s4779_s1 + $0x424] ss:$16 sps:$4 sm:$0xff]  }
  0x51   : > { %1820 = vmatpush1.bf16.msra.mxu1 %v3422_v18  ;;  %v3514_v18 = vld [vmem:[%s4779_s1 + $0x3cc] ss:$16 sps:$4 sm:$0xff]  }
  0x52   : > { %1832 = vmatprep.subr.bf16.mxu1 %v3430_v19  ;;  %v410_v19 = vpack.c.bf16 %v403_v15, %v396_v13  ;;  %v3601_v13 = vld [vmem:[%s4779_s1 + $0x5c4] ss:$16 sps:$4 sm:$0xff]   ;;  %v3590_v15 = vld [vmem:[%s4779_s1 + $0x568] ss:$16 sps:$4 sm:$0xff]  }
  0x53   : > { %1667 = vmatpush1.bf16.msra.mxu0 %v3437_v24  ;;  %v399_v24 = vld [vmem:[%s3854_s24 + $0x28] sm:$0xff] }
  0x54   : > { %1822 = vmatmul.mubr.bf16.vlgmr.msra.gmra.mrb[4].mxu1 %v408_v10  ;;  %1668 = vmatprep.subr.bf16.mxu0 %v3445_v25  ;;  %v3511_v10 = vld [vmem:[%s4779_s1 + $0x3e4] ss:$16 sps:$4 sm:$0xff]  }
  0x55   : > { %1833 = vmatpush1.bf16.msra.mxu1 %v3428_v22  ;;  %1864 = vmatprep.mubr.bf16.mxu1 %v411_v40  ;;  %v3512_v22 = vld [vmem:[%s4779_s1 + $0x3c8] ss:$16 sps:$4 sm:$0xff]   ;;  %v406_v25 = vld [vmem:[%s3854_s24 + $0x60] sm:$0xff] }
  0x56   : > { %1834 = vmatprep.subr.bf16.mxu1 %v3436_v23  ;;  %v3520_v23 = vld [vmem:[%s4779_s1 + $0x3ec] ss:$16 sps:$4 sm:$0xff]   ;;  %v3547_v40 = vld [vmem:[%s4779_s1 + $0x4a4] ss:$16 sps:$4 sm:$0xff]  }
  0x57   : > { %1669 = vmatpush1.bf16.msra.mxu0 %v3443_v28  ;;  %v3529_v28 = vld [vmem:[%s4779_s1 + $0x444] ss:$16 sps:$4 sm:$0xff]  }
  0x58   : > { %1670 = vmatprep.subr.bf16.mxu0 %v3451_v29  ;;  %v3518_v29 = vld [vmem:[%s4779_s1 + $0x3e8] ss:$16 sps:$4 sm:$0xff]  }
  0x59   : > { %1835 = vmatpush1.bf16.msra.mxu1 %v3434_v26  ;;  %v3521_v26 = vld [vmem:[%s4779_s1 + $0x420] ss:$16 sps:$4 sm:$0xff]  }
  0x5a   : > { %1836 = vmatprep.subr.bf16.mxu1 %v3442_v27  ;;  %v413_v27 = vpack.c.bf16 %v406_v25, %v399_v24  ;;  %v3619_v24 = vld [vmem:[%s4781_s3 + $0x4] ss:$8 sps:$4 sm:$0xff]   ;;  %v3602_v25 = vld [vmem:[%s4779_s1 + $0x5a8] ss:$16 sps:$4 sm:$0xff]  }
  0x5b   : > { %1671 = vmatpush1.bf16.msra.mxu0 %v3449_v32  ;;  %v3535_v32 = vld [vmem:[%s4779_s1 + $0x464] ss:$16 sps:$4 sm:$0xff]  }
  0x5c   : > { %1672 = vmatprep.subr.bf16.mxu0 %v3457_v33  ;;  %v3524_v33 = vld [vmem:[%s4779_s1 + $0x408] ss:$16 sps:$4 sm:$0xff]  }
  0x5d   : > { %1837 = vmatpush1.bf16.msra.mxu1 %v3440_v30  ;;  %v3526_v30 = vld [vmem:[%s4779_s1 + $0x40c] ss:$16 sps:$4 sm:$0xff]  }
  0x5e   : > { %1838 = vmatprep.subr.bf16.mxu1 %v3448_v31  ;;  %v3527_v31 = vld [vmem:[%s4779_s1 + $0x440] ss:$16 sps:$4 sm:$0xff]  }
  0x5f   : > { %1673 = vmatpush1.bf16.msra.mxu0 %v3455_v36  ;;  %v3541_v36 = vld [vmem:[%s4779_s1 + $0x484] ss:$16 sps:$4 sm:$0xff]  }
  0x60   : > { %1674 = vmatprep.subr.bf16.mxu0 %v3463_v39  ;;  %v3539_v39 = vld [vmem:[%s4779_s1 + $0x480] ss:$16 sps:$4 sm:$0xff]  }
  0x61   : > { %1839 = vmatpush1.bf16.msra.mxu1 %v3446_v34  ;;  %v3532_v34 = vld [vmem:[%s4779_s1 + $0x42c] ss:$16 sps:$4 sm:$0xff]  }
  0x62   : > { %1840 = vmatprep.subr.bf16.mxu1 %v3454_v35  ;;  %v3533_v35 = vld [vmem:[%s4779_s1 + $0x460] ss:$16 sps:$4 sm:$0xff]  }
  0x63   : > { %1675 = vmatpush1.bf16.msra.mxu0 %v3461_v43  ;;  %v3545_v43 = vld [vmem:[%s4779_s1 + $0x4a0] ss:$16 sps:$4 sm:$0xff]  }
  0x64   : > { %1676 = vmatprep.subr.bf16.mxu0 %v3469_v44  ;;  %v3553_v44 = vld [vmem:[%s4779_s1 + $0x4c4] ss:$16 sps:$4 sm:$0xff]  }
  0x65   : > { %1841 = vmatpush1.bf16.msra.mxu1 %v3452_v41  ;;  %v3536_v41 = vld [vmem:[%s4779_s1 + $0x448] ss:$16 sps:$4 sm:$0xff]  }
  0x66   : > { %1842 = vmatprep.subr.bf16.mxu1 %v3460_v42  ;;  %v3544_v42 = vld [vmem:[%s4779_s1 + $0x46c] ss:$16 sps:$4 sm:$0xff]  }
  0x67   : > { %1677 = vmatpush1.bf16.msra.mxu0 %v3467_v47  ;;  %v3551_v47 = vld [vmem:[%s4779_s1 + $0x4c0] ss:$16 sps:$4 sm:$0xff]  }
  0x68   : > { %1678 = vmatprep.subr.bf16.mxu0 %v3475_v48  ;;  %v3548_v48 = vld [vmem:[%s4779_s1 + $0x488] ss:$16 sps:$4 sm:$0xff]  }
  0x69   : > { %1843 = vmatpush1.bf16.msra.mxu1 %v3458_v45  ;;  %v3542_v45 = vld [vmem:[%s4779_s1 + $0x468] ss:$16 sps:$4 sm:$0xff]  }
  0x6a   : > { %1844 = vmatprep.subr.bf16.mxu1 %v3466_v46  ;;  %v3550_v46 = vld [vmem:[%s4779_s1 + $0x48c] ss:$16 sps:$4 sm:$0xff]  }
  0x6b   : > { %1679 = vmatpush1.bf16.msra.mxu0 %v3473_v51  ;;  %v3557_v51 = vld [vmem:[%s4779_s1 + $0x4e0] ss:$16 sps:$4 sm:$0xff]  }
  0x6c   : > { %1680 = vmatprep.subr.bf16.mxu0 %v3481_v52  ;;  %v3565_v52 = vld [vmem:[%s4779_s1 + $0x504] ss:$16 sps:$4 sm:$0xff]  }
  0x6d   : > { %1845 = vmatpush1.bf16.msra.mxu1 %v3464_v49  ;;  %v3556_v49 = vld [vmem:[%s4779_s1 + $0x4ac] ss:$16 sps:$4 sm:$0xff]  }
  0x6e   : > { %1846 = vmatprep.subr.bf16.mxu1 %v3472_v50  ;;  %v3559_v50 = vld [vmem:[%s4779_s1 + $0x4e4] ss:$16 sps:$4 sm:$0xff]  }
  0x6f   : > { %1681 = vmatpush1.bf16.msra.mxu0 %v3479_v55  ;;  %v3563_v55 = vld [vmem:[%s4779_s1 + $0x500] ss:$16 sps:$4 sm:$0xff]  }
  0x70   : > { %1682 = vmatprep.subr.bf16.mxu0 %v3487_v56  ;;  %v3571_v56 = vld [vmem:[%s4779_s1 + $0x524] ss:$16 sps:$4 sm:$0xff]  }
  0x71   : > { %1847 = vmatpush1.bf16.msra.mxu1 %v3470_v53  ;;  %v3554_v53 = vld [vmem:[%s4779_s1 + $0x4a8] ss:$16 sps:$4 sm:$0xff]  }
  0x72   : > { %1848 = vmatprep.subr.bf16.mxu1 %v3478_v54  ;;  %v3562_v54 = vld [vmem:[%s4779_s1 + $0x4cc] ss:$16 sps:$4 sm:$0xff]  }
  0x73   : > { %1683 = vmatpush1.bf16.msra.mxu0 %v3485_v59  ;;  %v3569_v59 = vld [vmem:[%s4779_s1 + $0x520] ss:$16 sps:$4 sm:$0xff]  }
  0x74   : > { %1684 = vmatprep.subr.bf16.mxu0 %v3493_v60  ;;  %v3577_v60 = vld [vmem:[%s4779_s1 + $0x544] ss:$16 sps:$4 sm:$0xff]  }
  0x75   : > { %1849 = vmatpush1.bf16.msra.mxu1 %v3476_v57  ;;  %v3560_v57 = vld [vmem:[%s4779_s1 + $0x4c8] ss:$16 sps:$4 sm:$0xff]  }
  0x76   : > { %1850 = vmatprep.subr.bf16.mxu1 %v3484_v58  ;;  %v3568_v58 = vld [vmem:[%s4779_s1 + $0x4ec] ss:$16 sps:$4 sm:$0xff]  }
  0x77   : > { %1685 = vmatpush1.bf16.msra.mxu0 %v3491_v63  ;;  %v3575_v63 = vld [vmem:[%s4779_s1 + $0x540] ss:$16 sps:$4 sm:$0xff]  }
  0x78   : > { %1686 = vmatprep.subr.bf16.mxu0 %v3499_v0  ;;  %v3583_v0 = vld [vmem:[%s4779_s1 + $0x564] ss:$16 sps:$4 sm:$0xff]  }
  0x79   : > { %1851 = vmatpush1.bf16.msra.mxu1 %v3482_v61  ;;  %v3566_v61 = vld [vmem:[%s4779_s1 + $0x4e8] ss:$16 sps:$4 sm:$0xff]  }
  0x7a   : > { %1852 = vmatprep.subr.bf16.mxu1 %v3490_v62  ;;  %v3574_v62 = vld [vmem:[%s4779_s1 + $0x50c] ss:$16 sps:$4 sm:$0xff]  }
  0x7b   : > { %1687 = vmatpush1.bf16.msra.mxu0 %v3497_v4  ;;  %v3581_v4 = vld [vmem:[%s4779_s1 + $0x560] ss:$16 sps:$4 sm:$0xff]  }
  0x7c   : > { %1688 = vmatprep.subr.bf16.mxu0 %v3505_v5  ;;  %v3589_v5 = vld [vmem:[%s4779_s1 + $0x584] ss:$16 sps:$4 sm:$0xff]  }
  0x7d   : > { %1853 = vmatpush1.bf16.msra.mxu1 %v3488_v1  ;;  %v3572_v1 = vld [vmem:[%s4779_s1 + $0x508] ss:$16 sps:$4 sm:$0xff]  }
  0x7e   : > { %1854 = vmatprep.subr.bf16.mxu1 %v3496_v3  ;;  %v3580_v3 = vld [vmem:[%s4779_s1 + $0x52c] ss:$16 sps:$4 sm:$0xff]  }
  0x7f   : > { %1689 = vmatpush1.bf16.msra.mxu0 %v3503_v8  ;;  %v3587_v8 = vld [vmem:[%s4779_s1 + $0x580] ss:$16 sps:$4 sm:$0xff]  }
  0x80   : > { %1690 = vmatprep.subr.bf16.mxu0 %v3511_v10  ;;  %v3584_v10 = vld [vmem:[%s4779_s1 + $0x548] ss:$16 sps:$4 sm:$0xff]  }
  0x81   : > { %1855 = vmatpush1.bf16.msra.mxu1 %v3494_v6  ;;  %v3578_v6 = vld [vmem:[%s4779_s1 + $0x528] ss:$16 sps:$4 sm:$0xff]  }
  0x82   : > { %1856 = vmatprep.subr.bf16.mxu1 %v3502_v7  ;;  %v3586_v7 = vld [vmem:[%s4779_s1 + $0x54c] ss:$16 sps:$4 sm:$0xff]  }
  0x83   : > { %1691 = vmatpush1.bf16.msra.mxu0 %v3509_v12  ;;  %v3593_v12 = vld [vmem:[%s4779_s1 + $0x5a0] ss:$16 sps:$4 sm:$0xff]  }
  0x84   : > { %1703 = vmatprep.subr.bf16.mxu0 %v3517_v16  ;;  %v3598_v16 = vld [vmem:[%s4779_s1 + $0x58c] ss:$16 sps:$4 sm:$0xff]  }
  0x85   : > { %1857 = vmatpush1.bf16.msra.mxu1 %v3500_v9  ;;  %v3595_v9 = vld [vmem:[%s4779_s1 + $0x5a4] ss:$16 sps:$4 sm:$0xff]  }
  0x86   : > { %1858 = vmatprep.subr.bf16.mxu1 %v3508_v11  ;;  %1693 = vmatmul.mubr.bf16.vlgmr.msra.gmra.mrb[0].mxu0 %v410_v19  ;;  %v3592_v11 = vld [vmem:[%s4779_s1 + $0x56c] ss:$16 sps:$4 sm:$0xff]  }
  0x87   : > { %1704 = vmatpush1.bf16.msra.mxu0 %v3515_v20  ;;  %1735 = vmatprep.mubr.bf16.mxu0 %v413_v27  ;;  %v3604_v20 = vld [vmem:[%s4779_s1 + $0x5ac] ss:$16 sps:$4 sm:$0xff]  }
  0x88   : > { %1705 = vmatprep.subr.bf16.mxu0 %v3523_v21  ;;  %v3605_v21 = vld [vmem:[%s4779_s1 + $0x5e0] ss:$16 sps:$4 sm:$0xff]  }
  0x89   : > { %1859 = vmatpush1.bf16.msra.mxu1 %v3506_v17  ;;  %v3599_v17 = vld [vmem:[%s4779_s1 + $0x5c0] ss:$16 sps:$4 sm:$0xff]  }
  0x8a   : > { %1860 = vmatprep.subr.bf16.mxu1 %v3514_v18  ;;  %v3607_v18 = vld [vmem:[%s4779_s1 + $0x5e4] ss:$16 sps:$4 sm:$0xff]  }
  0x8b   : > { %1706 = vmatpush1.bf16.msra.mxu0 %v3521_v26  ;;  %v3610_v26 = vld [vmem:[%s4779_s1 + $0x5cc] ss:$16 sps:$4 sm:$0xff]  }
  0x8c   : > { %1707 = vmatprep.subr.bf16.mxu0 %v3529_v28  ;;  %v3617_v28 = vld [vmem:[%s4781_s3] ss:$8 sps:$4 sm:$0xff]  }
  0x8d   : > { %1861 = vmatpush1.bf16.msra.mxu1 %v3512_v22  ;;  %v398_v22 = vld [vmem:[%s3854_s24 + $0x20] sm:$0xff] }
  0x8e   : > { %1862 = vmatprep.subr.bf16.mxu1 %v3520_v23  ;;  %v405_v23 = vld [vmem:[%s3854_s24 + $0x58] sm:$0xff] }
  0x8f   : > { %1708 = vmatpush1.bf16.msra.mxu0 %v3527_v31  ;;  %v3613_v31 = vld [vmem:[%s4779_s1 + $0x5ec] ss:$16 sps:$4 sm:$0xff]  }
  0x90   : > { %1709 = vmatprep.subr.bf16.mxu0 %v3535_v32  ;;  %v3620_v32 = vld [vmem:[%s4781_s3 + $0x10] ss:$8 sps:$4 sm:$0xff]  }
  0x91   : > { %1863 = vmatpush1.bf16.msra.mxu1 %v3518_v29  ;;  %v3622_v29 = vld [vmem:[%s4781_s3 + $0x14] ss:$8 sps:$4 sm:$0xff]  }
  0x92   : > { %1875 = vmatprep.subr.bf16.mxu1 %v3526_v30  ;;  %v3608_v30 = vld [vmem:[%s4779_s1 + $0x5c8] ss:$16 sps:$4 sm:$0xff]  }
  0x93   : > { %1710 = vmatpush1.bf16.msra.mxu0 %v3533_v35  ;;  %v3616_v35 = vld [vmem:[%s4779_s1 + $0x60c] ss:$16 sps:$4 sm:$0xff]  }
  0x94   : > { %1865 = vmatmul.mubr.bf16.vlgmr.msra.gmra.mrb[4].mxu1 %v410_v19  ;;  %1711 = vmatprep.subr.bf16.mxu0 %v3541_v36  ;;  %v3596_v19 = vld [vmem:[%s4779_s1 + $0x588] ss:$16 sps:$4 sm:$0xff]  }
  0x95   : > { %1876 = vmatpush1.bf16.msra.mxu1 %v3524_v33  ;;  %1907 = vmatprep.mubr.bf16.mxu1 %v413_v27  ;;  %v412_v27 = vpack.c.bf16 %v405_v23, %v398_v22  ;;  %v3625_v33 = vld [vmem:[%s4781_s3 + $0x24] ss:$8 sps:$4 sm:$0xff]   ;;  %v3623_v36 = vld [vmem:[%s4781_s3 + $0x20] ss:$8 sps:$4 sm:$0xff]  }
  0x96   : > { %1877 = vmatprep.subr.bf16.mxu1 %v3532_v34  ;;  %v3611_v34 = vld [vmem:[%s4779_s1 + $0x5e8] ss:$16 sps:$4 sm:$0xff]  }
  0x97   : > { %1712 = vmatpush1.bf16.msra.mxu0 %v3539_v39  ;;  %v3626_v39 = vld [vmem:[%s4781_s3 + $0x30] ss:$8 sps:$4 sm:$0xff]  }
  0x98   : > { %1713 = vmatprep.subr.bf16.mxu0 %v3547_v40  ;;  %v3631_v40 = vld [vmem:[%s4781_s3 + $0x44] ss:$8 sps:$4 sm:$0xff]  }
  0x99   : > { %1878 = vmatpush1.bf16.msra.mxu1 %v3530_v37  ;;  %v3628_v37 = vld [vmem:[%s4781_s3 + $0x34] ss:$8 sps:$4 sm:$0xff]  }
  0x9a   : > { %1879 = vmatprep.subr.bf16.mxu1 %v3538_v38  ;;  %v3614_v38 = vld [vmem:[%s4779_s1 + $0x608] ss:$16 sps:$4 sm:$0xff]  }
  0x9b   : > { %1714 = vmatpush1.bf16.msra.mxu0 %v3545_v43  ;;  %v3632_v43 = vld [vmem:[%s4781_s3 + $0x50] ss:$8 sps:$4 sm:$0xff]  }
  0x9c   : > { %1715 = vmatprep.subr.bf16.mxu0 %v3553_v44  ;;  %v3635_v44 = vld [vmem:[%s4781_s3 + $0x60] ss:$8 sps:$4 sm:$0xff]  }
  0x9d   : > { %1880 = vmatpush1.bf16.msra.mxu1 %v3536_v41  ;;  %v3629_v41 = vld [vmem:[%s4781_s3 + $0x40] ss:$8 sps:$4 sm:$0xff]  }
  0x9e   : > { %1881 = vmatprep.subr.bf16.mxu1 %v3544_v42  ;;  %v3634_v42 = vld [vmem:[%s4781_s3 + $0x54] ss:$8 sps:$4 sm:$0xff]  }
  0x9f   : > { %1716 = vmatpush1.bf16.msra.mxu0 %v3551_v47  ;;  %v3643_v47 = vld [vmem:[%s4781_s3 + $0x84] ss:$8 sps:$4 sm:$0xff]  }
  0xa0   : > { %1717 = vmatprep.subr.bf16.mxu0 %v3559_v50  ;;  %v3646_v50 = vld [vmem:[%s4781_s3 + $0x94] ss:$8 sps:$4 sm:$0xff]  }
  0xa1   : > { %1882 = vmatpush1.bf16.msra.mxu1 %v3542_v45  ;;  %v3640_v45 = vld [vmem:[%s4781_s3 + $0x74] ss:$8 sps:$4 sm:$0xff]  }
  0xa2   : > { %1883 = vmatprep.subr.bf16.mxu1 %v3550_v46  ;;  %v3638_v46 = vld [vmem:[%s4781_s3 + $0x70] ss:$8 sps:$4 sm:$0xff]  }
  0xa3   : > { %1718 = vmatpush1.bf16.msra.mxu0 %v3557_v51 }
  0xa4   : > { %1719 = vmatprep.subr.bf16.mxu0 %v3565_v52 }
  0xa5   : > { %1884 = vmatpush1.bf16.msra.mxu1 %v3548_v48 }
  0xa6   : > { %1885 = vmatprep.subr.bf16.mxu1 %v3556_v49 }
  0xa7   : > { %1720 = vmatpush1.bf16.msra.mxu0 %v3563_v55  ;;  %v3647_v55 = vld [vmem:[%s4781_s3 + $0xa0] ss:$8 sps:$4 sm:$0xff]  }
  0xa8   : > { %1721 = vmatprep.subr.bf16.mxu0 %v3571_v56  ;;  %v3652_v56 = vld [vmem:[%s4781_s3 + $0xb4] ss:$8 sps:$4 sm:$0xff]  }
  0xa9   : > { %1886 = vmatpush1.bf16.msra.mxu1 %v3554_v53  ;;  %v3644_v53 = vld [vmem:[%s4781_s3 + $0x90] ss:$8 sps:$4 sm:$0xff]  }
  0xaa   : > { %1887 = vmatprep.subr.bf16.mxu1 %v3562_v54  ;;  %v3649_v54 = vld [vmem:[%s4781_s3 + $0xa4] ss:$8 sps:$4 sm:$0xff]  }
  0xab   : > { %1722 = vmatpush1.bf16.msra.mxu0 %v3569_v59  ;;  %v3653_v59 = vld [vmem:[%s4781_s3 + $0xc0] ss:$8 sps:$4 sm:$0xff]  }
  0xac   : > { %1723 = vmatprep.subr.bf16.mxu0 %v3577_v60  ;;  %v3658_v60 = vld [vmem:[%s4781_s3 + $0xd4] ss:$8 sps:$4 sm:$0xff]  }
  0xad   : > { %1888 = vmatpush1.bf16.msra.mxu1 %v3560_v57  ;;  %v3650_v57 = vld [vmem:[%s4781_s3 + $0xb0] ss:$8 sps:$4 sm:$0xff]  }
  0xae   : > { %1889 = vmatprep.subr.bf16.mxu1 %v3568_v58  ;;  %v3655_v58 = vld [vmem:[%s4781_s3 + $0xc4] ss:$8 sps:$4 sm:$0xff]  }
  0xaf   : > { %1724 = vmatpush1.bf16.msra.mxu0 %v3575_v63  ;;  %v3659_v63 = vld [vmem:[%s4781_s3 + $0xe0] ss:$8 sps:$4 sm:$0xff]  }
  0xb0   : > { %1725 = vmatprep.subr.bf16.mxu0 %v3583_v0  ;;  %v3664_v0 = vld [vmem:[%s4781_s3 + $0xf4] ss:$8 sps:$4 sm:$0xff]  }
  0xb1   : > { %1890 = vmatpush1.bf16.msra.mxu1 %v3566_v61  ;;  %v3656_v61 = vld [vmem:[%s4781_s3 + $0xd0] ss:$8 sps:$4 sm:$0xff]  }
  0xb2   : > { %1891 = vmatprep.subr.bf16.mxu1 %v3574_v62  ;;  %v3661_v62 = vld [vmem:[%s4781_s3 + $0xe4] ss:$8 sps:$4 sm:$0xff]  }
  0xb3   : > { %1726 = vmatpush1.bf16.msra.mxu0 %v3581_v4  ;;  %v3713_v4 = vld [vmem:[%s4783_s5 + $0x40] sm:$0xff]  }
  0xb4   : > { %1727 = vmatprep.subr.bf16.mxu0 %v3589_v5  ;;  %v3714_v5 = vld [vmem:[%s4783_s5] sm:$0xff]  }
  0xb5   : > { %1892 = vmatpush1.bf16.msra.mxu1 %v3572_v1  ;;  %v3662_v1 = vld [vmem:[%s4781_s3 + $0xf0] ss:$8 sps:$4 sm:$0xff]  }
  0xb6   : > { %1893 = vmatprep.subr.bf16.mxu1 %v3580_v3  ;;  %v3667_v3 = vld [vmem:[%s4781_s3 + $0x104] ss:$8 sps:$4 sm:$0xff]  }
  0xb7   : > { %1728 = vmatpush1.bf16.msra.mxu0 %v3587_v8  ;;  %v3717_v8 = vld [vmem:[%s4783_s5 + $0x50] sm:$0xff]  }
  0xb8   : > { %1729 = vmatprep.subr.bf16.mxu0 %v3595_v9  ;;  %v3718_v9 = vld [vmem:[%s4783_s5 + $0x10] sm:$0xff]  }
  0xb9   : > { %1894 = vmatpush1.bf16.msra.mxu1 %v3578_v6  ;;  %v3715_v6 = vld [vmem:[%s4783_s5 + $0x48] sm:$0xff]  }
  0xba   : > { %1895 = vmatprep.subr.bf16.mxu1 %v3586_v7  ;;  %v3716_v7 = vld [vmem:[%s4783_s5 + $0x8] sm:$0xff]  }
  0xbb   : > { %1730 = vmatpush1.bf16.msra.mxu0 %v3593_v12  ;;  %v3721_v12 = vld [vmem:[%s4783_s5 + $0x60] sm:$0xff]  }
  0xbc   : > { %1731 = vmatprep.subr.bf16.mxu0 %v3601_v13  ;;  %v3722_v13 = vld [vmem:[%s4783_s5 + $0x20] sm:$0xff]  }
  0xbd   : > { %1896 = vmatpush1.bf16.msra.mxu1 %v3584_v10  ;;  %v3719_v10 = vld [vmem:[%s4783_s5 + $0x58] sm:$0xff]  }
  0xbe   : > { %1897 = vmatprep.subr.bf16.mxu1 %v3592_v11  ;;  %v3720_v11 = vld [vmem:[%s4783_s5 + $0x18] sm:$0xff]  }
  0xbf   : > { %1732 = vmatpush1.bf16.msra.mxu0 %v3599_v17 }
  0xc0   : > { %1733 = vmatprep.subr.bf16.mxu0 %v3607_v18 }
  0xc1   : > { %1898 = vmatpush1.bf16.msra.mxu1 %v3590_v15  ;;  %v3723_v15 = vld [vmem:[%s4783_s5 + $0x68] sm:$0xff]  }
  0xc2   : > { %1899 = vmatprep.subr.bf16.mxu1 %v3598_v16  ;;  %v613_v16 = vlaneseq }
  0xc3   : > { %1734 = vmatpush1.bf16.msra.mxu0 %v3605_v21 }
  0xc4   : > { %2369 = vmatprep.subr.bf16.mxu0 %v3619_v24  ;;  %v4578_v17 = vshrl.u32 %v613_v16, 7  ;;  %v3700_v16 = vld [vmem:[%s4781_s3 + $0x1b4] ss:$8 sps:$4 sm:$0xff]  }
  0xc5   : > { %1900 = vmatpush1.bf16.msra.mxu1 %v3596_v19  ;;  %v611_v19 = vld [vmem:[%s4780_s2] sm:$0xf] }
  0xc6   : > { %1901 = vmatprep.subr.bf16.mxu1 %v3604_v20  ;;  %1736 = vmatmul.mubr.bf16.vlgmr.msra.gmra.mrb[0].mxu0 %v412_v27  ;;  %v615_v18 = vsub.s32 0, %v4578_v17  ;;  %v619_v20 = vsub.s32 1, %v4578_v17 }
  0xc7   : > { %2370 = vmatpush1.bf16.msra.mxu0 %v3617_v28 }
  0xc8   : > { %2371 = vmatprep.subr.bf16.mxu0 %v3622_v29  ;;  %v616_v21 = vrot.slane %v611_v19, %v615_v18  ;;  %v620_v22 = vrot.slane %v611_v19, %v619_v20 }
  0xc9   : > { %1902 = vmatpush1.bf16.msra.mxu1 %v3602_v25 }
  0xca   : > { %1903 = vmatprep.subr.bf16.mxu1 %v3610_v26 }
  0xcb   : > { %2372 = vmatpush1.bf16.msra.mxu0 %v3620_v32 }
  0xcc   : > { %2373 = vmatprep.subr.bf16.mxu0 %v3625_v33 }
  0xcd   : > { %1904 = vmatpush1.bf16.msra.mxu1 %v3608_v30 }
  0xce   : > { %1905 = vmatprep.subr.bf16.mxu1 %v3613_v31 }
  0xcf   : > { %2374 = vmatpush1.bf16.msra.mxu0 %v3623_v36 }
  0xd0   : > { %2375 = vmatprep.subr.bf16.mxu0 %v3628_v37 }
  0xd1   : > { %1906 = vmatpush1.bf16.msra.mxu1 %v3611_v34 }
  0xd2   : > { %1918 = vmatprep.subr.bf16.mxu1 %v3616_v35 }
  0xd3   : > { %2376 = vmatpush1.bf16.msra.mxu0 %v3626_v39 }
  0xd4   : > { %1908 = vmatmul.mubr.bf16.vlgmr.msra.gmra.mrb[4].mxu1 %v412_v27  ;;  %2377 = vmatprep.subr.bf16.mxu0 %v3631_v40 }
  0xd5   : > { %1919 = vmatpush1.bf16.msra.mxu1 %v3614_v38  ;;  %1950 = vmatprep.mubr.bf16.mxu1 %v3749_v2  ;;  %v3637_v2 = vld [vmem:[%s4781_s3 + $0x64] ss:$8 sps:$4 sm:$0xff]  }
  0xd6   : > { %3203 = vmatprep.subr.bf16.mxu1 %v3713_v4  ;;  %v3680_v4 = vld [vmem:[%s4781_s3 + $0x150] ss:$8 sps:$4 sm:$0xff]  }
  0xd7   : > { %2378 = vmatpush1.bf16.msra.mxu0 %v3629_v41  ;;  %v3665_v41 = vld [vmem:[%s4781_s3 + $0x100] ss:$8 sps:$4 sm:$0xff]  }
  0xd8   : > { %2379 = vmatprep.subr.bf16.mxu0 %v3634_v42  ;;  %v3670_v42 = vld [vmem:[%s4781_s3 + $0x114] ss:$8 sps:$4 sm:$0xff]  }
  0xdb   : > { %2380 = vmatpush1.bf16.msra.mxu0 %v3632_v43  ;;  %v3668_v43 = vld [vmem:[%s4781_s3 + $0x110] ss:$8 sps:$4 sm:$0xff]  }
  0xdc   : > { %2381 = vmatprep.subr.bf16.mxu0 %v3637_v2  ;;  %v623_v2 = vsub.s32 2, %v4578_v17 }
  0xdf   : > { %2382 = vmatpush1.bf16.msra.mxu0 %v3635_v44  ;;  %v3673_v44 = vld [vmem:[%s4781_s3 + $0x124] ss:$8 sps:$4 sm:$0xff]  }
  0xe0   : > { %3104 = vmatmul.mubr.msk.bf16.vlgmr.msra.gmra.mrb[4].mxu1 %vm1613_vm0, %v3864_v14  ;;  %2383 = vmatprep.subr.bf16.mxu0 %v3640_v45  ;;  %v3641_v14 = vld [vmem:[%s4781_s3 + $0x80] ss:$8 sps:$4 sm:$0xff]   ;;  %v627_v45 = vsub.s32 3, %v4578_v17 }
  0xe1   : > { %3204 = vmatpush3.bf16.msra.mxu1 %v3714_v5  ;;  %v3685_v5 = vld [vmem:[%s4781_s3 + $0x164] ss:$8 sps:$4 sm:$0xff]  }
  0xe2   : > { %3205 = vmatprep.subr.bf16.mxu1 %v3715_v6  ;;  %v3683_v6 = vld [vmem:[%s4781_s3 + $0x160] ss:$8 sps:$4 sm:$0xff]  }
  0xe3   : > { %2384 = vmatpush1.bf16.msra.mxu0 %v3638_v46  ;;  %v3671_v46 = vld [vmem:[%s4781_s3 + $0x120] ss:$8 sps:$4 sm:$0xff]  }
  0xe4   : > { %2385 = vmatprep.subr.bf16.mxu0 %v3643_v47  ;;  %v624_v47 = vrot.slane %v611_v19, %v623_v2  ;;  %v3730_v17 = vld [vmem:[%s4785_s7 + $0x8] sm:$0xff]  }
  0xe5   : > { %3206 = vmatpush3.bf16.msra.mxu1 %v3716_v7  ;;  %v3688_v7 = vld [vmem:[%s4781_s3 + $0x174] ss:$8 sps:$4 sm:$0xff]  }
  0xe6   : > { %3207 = vmatprep.subr.bf16.mxu1 %v3717_v8  ;;  %v3686_v8 = vld [vmem:[%s4781_s3 + $0x170] ss:$8 sps:$4 sm:$0xff]  }
  0xe7   : > { %v4489_v48 = vpop.f32.mrb[0].mxu1  ;;  %2386 = vmatpush1.bf16.msra.mxu0 %v3641_v14  ;;  %v628_v14 = vrot.slane %v611_v19, %v627_v45  ;;  %v3698_v19 = vld [vmem:[%s4781_s3 + $0x1b0] ss:$8 sps:$4 sm:$0xff]  }
  0xe8   : > { %v4494_v49 = vpop.f32.mrb[1].mxu1  ;;  %2387 = vmatprep.subr.bf16.mxu0 %v3646_v50  ;;  %v3674_v50 = vld [vmem:[%s4781_s3 + $0x130] ss:$8 sps:$4 sm:$0xff]  }
  0xe9   : > { %v4499_v51 = vpop.f32.mrb[2].mxu1  ;;  %3208 = vmatpush3.bf16.msra.mxu1 %v3718_v9  ;;  %v3691_v9 = vld [vmem:[%s4781_s3 + $0x184] ss:$8 sps:$4 sm:$0xff]  }
  0xea   : > { %v4501_v52 = vpop.f32.mrb[3].mxu1  ;;  %3209 = vmatprep.subr.bf16.mxu1 %v3719_v10  ;;  %v3689_v10 = vld [vmem:[%s4781_s3 + $0x180] ss:$8 sps:$4 sm:$0xff]  }
  0xeb   : > { %2388 = vmatpush1.bf16.msra.mxu0 %v3644_v53  ;;  %v3679_v53 = vld [vmem:[%s4781_s3 + $0x144] ss:$8 sps:$4 sm:$0xff]  }
  0xec   : > { %2389 = vmatprep.subr.bf16.mxu0 %v3649_v54 }
  0xed   : > { %3210 = vmatpush3.bf16.msra.mxu1 %v3720_v11  ;;  %v3694_v11 = vld [vmem:[%s4781_s3 + $0x194] ss:$8 sps:$4 sm:$0xff]  }
  0xee   : > { %3211 = vmatprep.subr.bf16.mxu1 %v3721_v12  ;;  %v3692_v12 = vld [vmem:[%s4781_s3 + $0x190] ss:$8 sps:$4 sm:$0xff]  }
  0xef   : > { %2390 = vmatpush1.bf16.msra.mxu0 %v3647_v55 }
  0xf0   : > { %2391 = vmatprep.subr.bf16.mxu0 %v3652_v56 }
  0xf1   : > { %3212 = vmatpush3.bf16.msra.mxu1 %v3722_v13  ;;  %v3697_v13 = vld [vmem:[%s4781_s3 + $0x1a4] ss:$8 sps:$4 sm:$0xff]  }
  0xf2   : > { %3213 = vmatprep.subr.bf16.mxu1 %v3723_v15  ;;  %v3695_v15 = vld [vmem:[%s4781_s3 + $0x1a0] ss:$8 sps:$4 sm:$0xff]  }
  0xf3   : > { %2392 = vmatpush1.bf16.msra.mxu0 %v3650_v57 }
  0xf4   : > { %2393 = vmatprep.subr.bf16.mxu0 %v3655_v58 }
  0xf7   : > { %2394 = vmatpush1.bf16.msra.mxu0 %v3653_v59  ;;  %v3677_v59 = vld [vmem:[%s4781_s3 + $0x140] ss:$8 sps:$4 sm:$0xff]  }
  0xf8   : > { %2395 = vmatprep.subr.bf16.mxu0 %v3658_v60 }
  0xfb   : > { %2396 = vmatpush1.bf16.msra.mxu0 %v3656_v61 }
  0xfc   : > { %2397 = vmatprep.subr.bf16.mxu0 %v3661_v62  ;;  %v3682_v62 = vld [vmem:[%s4781_s3 + $0x154] ss:$8 sps:$4 sm:$0xff]  }
  0xff   : > { %2398 = vmatpush1.bf16.msra.mxu0 %v3659_v63 }
 0x100   : > { %2399 = vmatprep.subr.bf16.mxu0 %v3664_v0 }
 0x103   : > { %2400 = vmatpush1.bf16.msra.mxu0 %v3662_v1 }
 0x104   : > { %2412 = vmatprep.subr.bf16.mxu0 %v3667_v3 }
 0x199   : > { %v1737_v23 = vpop.f32.mrb[0].mxu0 }
 0x19a   : > { %v3271_v24 = vadd.f32 %v1737_v23, %v616_v21  ;;  %v1739_v25 = vpop.f32.mrb[1].mxu0  ;;  %v3706_v23 = vld [vmem:[%s4781_s3 + $0x1d4] ss:$8 sps:$4 sm:$0xff]  }
 0x19b   : > { %v3273_v26 = vadd.f32 %v1739_v25, %v620_v22  ;;  %v1741_v27 = vpop.f32.mrb[2].mxu0  ;;  %v3709_v25 = vld [vmem:[%s4781_s3 + $0x1e4] ss:$8 sps:$4 sm:$0xff]  }
 0x19c   : > { %v3272_v28 = vadd.f32 %v3271_v24, %v4489_v48  ;;  %v3275_v29 = vadd.f32 %v1741_v27, %v616_v21  ;;  %v1743_v30 = vpop.f32.mrb[3].mxu0  ;;  %v3676_v48 = vld [vmem:[%s4781_s3 + $0x134] ss:$8 sps:$4 sm:$0xff]   ;;  %v3703_v21 = vld [vmem:[%s4781_s3 + $0x1c4] ss:$8 sps:$4 sm:$0xff]  }
 0x19d   : > { %v3274_v31 = vadd.f32 %v3273_v26, %v4494_v49  ;;  %v3277_v32 = vadd.f32 %v1743_v30, %v620_v22  ;;  %v3701_v22 = vld [vmem:[%s4781_s3 + $0x1c0] ss:$8 sps:$4 sm:$0xff]   ;;  %v3704_v24 = vld [vmem:[%s4781_s3 + $0x1d0] ss:$8 sps:$4 sm:$0xff]   ;;  %v3712_v27 = vld [vmem:[%s4781_s3 + $0x1f4] ss:$8 sps:$4 sm:$0xff]  }
 0x19e   : > { %v3276_v33 = vadd.f32 %v3275_v29, %v4499_v51  ;;  %v1961_v35 = vmax.f32 %v3272_v28, 0.0  ;;  %v3707_v26 = vld [vmem:[%s4781_s3 + $0x1e0] ss:$8 sps:$4 sm:$0xff]   ;;  %v3710_v28 = vld [vmem:[%s4781_s3 + $0x1f0] ss:$8 sps:$4 sm:$0xff]  }
 0x19f   : > { %v3278_v34 = vadd.f32 %v3277_v32, %v4501_v52  ;;  %v1962_v37 = vmax.f32 %v3274_v31, 0.0  ;;  %v3724_v29 = vld [vmem:[%s4783_s5 + $0x28] sm:$0xff]   ;;  %v3725_v30 = vld [vmem:[%s4783_s5 + $0x70] sm:$0xff]   ;;  %v3727_v32 = vld [vmem:[%s4783_s5 + $0x78] sm:$0xff]  }
 0x1a0   : > { %v1965_v36 = vmax.f32 %v3276_v33, 0.0  ;;  %3214 = vmatpush3.bf16.msra.mxu1 %v3724_v29  ;;  %v3726_v31 = vld [vmem:[%s4783_s5 + $0x30] sm:$0xff]   ;;  %v3728_v33 = vld [vmem:[%s4783_s5 + $0x38] sm:$0xff]  }
 0x1a1   : > { %v1966_v38 = vmax.f32 %v3278_v34, 0.0  ;;  %3215 = vmatprep.subr.bf16.mxu1 %v3725_v30  ;;  %v3750_v34 = vmov 0.0  }
 0x1a2   : > { %v1969_v39 = vpack.c.bf16 %v1965_v36, %v1961_v35  ;;  %v2037_v35 = vld [vmem:[%s4782_s4] sm:$0x3] }
 0x1a3   : > { %v1970_v40 = vpack.c.bf16 %v1966_v38, %v1962_v37  ;;  %v2042_v36 = vrot.slane %v2037_v35, %v615_v18  ;;  %v2046_v37 = vrot.slane %v2037_v35, %v619_v20  ;;  %v3729_v18 = vld [vmem:[%s4785_s7] sm:$0xff]   ;;  %v3731_v20 = vld [vmem:[%s4785_s7 + $0x10] sm:$0xff]  }
 0x1a4   : > { %3216 = vmatpush3.bf16.msra.mxu1 %v3726_v31 }
 0x1a5   : > { %2401 = vmatprep.mubr.bf16.mxu0 %v1970_v40  ;;  %3217 = vmatprep.subr.bf16.mxu1 %v3727_v32 }
 0x1a6   : > { %2402 = vmatmul.mubr.bf16.vlgmr.msra.gmra.mrb[4].mxu0 %v1969_v39 }
 0x1a7   : > { %2413 = vmatpush1.bf16.msra.mxu0 %v3665_v41 }
 0x1a8   : > { %2414 = vmatprep.subr.bf16.mxu0 %v3670_v42  ;;  %3218 = vmatpush3.bf16.msra.mxu1 %v3728_v33 }
 0x1a9   : > { %3239 = vmatprep.subr.bf16.mxu1 %v3750_v34 }
 0x1ab   : > { %2415 = vmatpush1.bf16.msra.mxu0 %v3668_v43 }
 0x1ac   : > { %2416 = vmatprep.subr.bf16.mxu0 %v3673_v44 }
 0x1af   : > { %2417 = vmatpush1.bf16.msra.mxu0 %v3671_v46 }
 0x1b0   : > { %2418 = vmatprep.subr.bf16.mxu0 %v3676_v48 }
 0x1b3   : > { %v1952_v49 = vpop.f32.mrb[4].mxu1  ;;  %2419 = vmatpush1.bf16.msra.mxu0 %v3674_v50  ;;  %v3732_v50 = vld [vmem:[%s4785_s7 + $0x18] sm:$0xff]  }
 0x1b4   : > { %v3279_v51 = vadd.f32 %v1952_v49, %v624_v47  ;;  %v1954_v52 = vpop.f32.mrb[5].mxu1  ;;  %2420 = vmatprep.subr.bf16.mxu0 %v3679_v53  ;;  %v3735_v53 = vld [vmem:[%s4785_s7 + $0x30] sm:$0xff]  }
 0x1b5   : > { %v3280_v54 = vadd.f32 %v1954_v52, %v628_v14  ;;  %v1956_v55 = vpop.f32.mrb[6].mxu1  ;;  %v3734_v52 = vld [vmem:[%s4785_s7 + $0x28] sm:$0xff]  }
 0x1b6   : > { %v3281_v56 = vadd.f32 %v1956_v55, %v624_v47  ;;  %v1958_v57 = vpop.f32.mrb[7].mxu1  ;;  %v1963_v60 = vmax.f32 %v3279_v51, 0.0  ;;  %v3733_v51 = vld [vmem:[%s4785_s7 + $0x20] sm:$0xff]  }
 0x1b7   : > { %v3282_v58 = vadd.f32 %v1958_v57, %v628_v14  ;;  %v1964_v63 = vmax.f32 %v3280_v54, 0.0  ;;  %2421 = vmatpush1.bf16.msra.mxu0 %v3677_v59  ;;  %v3736_v54 = vld [vmem:[%s4785_s7 + $0x38] sm:$0xff]  }
 0x1b8   : > { %v1967_v61 = vmax.f32 %v3281_v56, 0.0  ;;  %2422 = vmatprep.subr.bf16.mxu0 %v3682_v62  ;;  %v3169_v56 = vld [vmem:[%s4784_s6] ss:$0 sm:$0xff] }
 0x1b9   : > { %v1968_v0 = vmax.f32 %v3282_v58, 0.0 }
 0x1ba   : > { %v1971_v1 = vpack.c.bf16 %v1967_v61, %v1963_v60 }
 0x1bb   : > { %v1972_v3 = vpack.c.bf16 %v1968_v0, %v1964_v63  ;;  %2423 = vmatpush1.bf16.msra.mxu0 %v3680_v4 }
 0x1bc   : > { %2424 = vmatprep.subr.bf16.mxu0 %v3685_v5  ;;  %v3738_v5 = vld [vmem:[%s4787_s9 + $0x8] sm:$0xff]  }
 0x1bd   : > { %2444 = vmatprep.mubr.bf16.mxu0 %v1972_v3  ;;  %v3737_v3 = vld [vmem:[%s4787_s9] sm:$0xff]  }
 0x1bf   : > { %2425 = vmatpush1.bf16.msra.mxu0 %v3683_v6  ;;  %v3739_v6 = vld [vmem:[%s4787_s9 + $0x10] sm:$0xff]  }
 0x1c0   : > { %2426 = vmatprep.subr.bf16.mxu0 %v3688_v7  ;;  %v3740_v7 = vld [vmem:[%s4787_s9 + $0x18] sm:$0xff]  }
 0x1c3   : > { %2427 = vmatpush1.bf16.msra.mxu0 %v3686_v8  ;;  %v3186_v8 = vld [vmem:[%s4786_s8] ss:$0 sm:$0xff] }
 0x1c4   : > { %2428 = vmatprep.subr.bf16.mxu0 %v3691_v9 }
 0x1c7   : > { %2429 = vmatpush1.bf16.msra.mxu0 %v3689_v10 }
 0x1c8   : > { %2430 = vmatprep.subr.bf16.mxu0 %v3694_v11 }
 0x1cb   : > { %2431 = vmatpush1.bf16.msra.mxu0 %v3692_v12 }
 0x1cc   : > { %2432 = vmatprep.subr.bf16.mxu0 %v3697_v13 }
 0x1cf   : > { %2433 = vmatpush1.bf16.msra.mxu0 %v3695_v15 }
 0x1d0   : > { %2434 = vmatprep.subr.bf16.mxu0 %v3700_v16 }
 0x1d3   : > { %2435 = vmatpush1.bf16.msra.mxu0 %v3698_v19 }
 0x1d4   : > { %2436 = vmatprep.subr.bf16.mxu0 %v3703_v21 }
 0x1d7   : > { %2437 = vmatpush1.bf16.msra.mxu0 %v3701_v22  ;;  %v3195_v22 = vld [vmem:[%s4788_s10] ss:$0 sm:$0xff] }
 0x1d8   : > { %2438 = vmatprep.subr.bf16.mxu0 %v3706_v23 }
 0x1db   : > { %2439 = vmatpush1.bf16.msra.mxu0 %v3704_v24 }
 0x1dc   : > { %2440 = vmatprep.subr.bf16.mxu0 %v3709_v25 }
 0x1df   : > { %2441 = vmatpush1.bf16.msra.mxu0 %v3707_v26 }
 0x1e0   : > { %2442 = vmatprep.subr.bf16.mxu0 %v3712_v27 }
 0x1e3   : > { %2443 = vmatpush1.bf16.msra.mxu0 %v3710_v28 }
 0x1e6   : > { %2445 = vmatmul.mubr.bf16.vlgmr.msra.gmra.mrb[4].mxu0 %v1971_v1 }
 0x2b9   : > { %v2446_v38 = vpop.f32.mrb[4].mxu0 }
 0x2ba   : > { %v3283_v39 = vadd.f32 %v2446_v38, %v2042_v36  ;;  %v2448_v40 = vpop.f32.mrb[5].mxu0 }
 0x2bb   : > { %v3284_v41 = vadd.f32 %v2448_v40, %v2046_v37  ;;  %v2450_v42 = vpop.f32.mrb[6].mxu0 }
 0x2bc   : > { %v3285_v43 = vadd.f32 %v2450_v42, %v2042_v36  ;;  %v2452_v2 = vpop.f32.mrb[7].mxu0  ;;  %v2455_v45 = vmax.f32 %v3283_v39, 0.0 }
 0x2bd   : > { %v3286_v44 = vadd.f32 %v2452_v2, %v2046_v37  ;;  %v2456_v47 = vmax.f32 %v3284_v41, 0.0 }
 0x2be   : > { %v2457_v46 = vmax.f32 %v3285_v43, 0.0 }
 0x2bf   : > { %v2458_v48 = vmax.f32 %v3286_v44, 0.0 }
 0x2c0   : > { %v2459_v14 = vpack.c.bf16 %v2457_v46, %v2455_v45 }
 0x2c1   : > { %v2460_v49 = vpack.c.bf16 %v2458_v48, %v2456_v47 }
 0x2c3   : > { %2628 = vmatprep.mubr.bf16.mxu1 %v2460_v49 }
 0x2c4   : > { %2629 = vmatmul.mubr.bf16.vlgmr.msra.gmra.mrb[8].mxu1 %v2459_v14 }
 0x2c5   : > { %3240 = vmatpush3.bf16.msra.mxu1 %v3729_v18  ;;  %3255 = vmatprep.mubr.msk.bf16.mxu1 %vm3751_vm1, %v3750_v34 }
 0x2c6   : > { %3241 = vmatprep.subr.bf16.mxu1 %v3750_v34 }
 0x2c9   : > { %3242 = vmatpush3.bf16.msra.mxu1 %v3730_v17 }
 0x2ca   : > { %3243 = vmatprep.subr.bf16.mxu1 %v3750_v34 }
 0x2cd   : > { %3244 = vmatpush3.bf16.msra.mxu1 %v3731_v20 }
 0x2ce   : > { %3245 = vmatprep.subr.bf16.mxu1 %v3750_v34 }
 0x2d1   : > { %3246 = vmatpush3.bf16.msra.mxu1 %v3732_v50 }
 0x2d2   : > { %3247 = vmatprep.subr.bf16.mxu1 %v3750_v34 }
 0x2d5   : > { %3248 = vmatpush3.bf16.msra.mxu1 %v3733_v51 }
 0x2d6   : > { %3249 = vmatprep.subr.bf16.mxu1 %v3750_v34 }
 0x2d9   : > { %3250 = vmatpush3.bf16.msra.mxu1 %v3734_v52 }
 0x2da   : > { %3251 = vmatprep.subr.bf16.mxu1 %v3750_v34 }
 0x2dd   : > { %3252 = vmatpush3.bf16.msra.mxu1 %v3735_v53 }
 0x2de   : > { %3253 = vmatprep.subr.bf16.mxu1 %v3750_v34 }
 0x2e1   : > { %3254 = vmatpush3.bf16.msra.mxu1 %v3736_v54 }
 0x2e2   : > { %3259 = vmatprep.subr.bf16.mxu1 %v3750_v34 }
 0x397   : > { %v3219_v55 = vpop.f32.mrb[8].mxu1 }
 0x398   : > { %v3220_v57 = vpop.f32.mrb[9].mxu1 }
 0x399   : > { %v3221_v58 = vadd.f32 %v3220_v57, %v3219_v55  ;;  %v3222_v59 = vpop.f32.mrb[10].mxu1 }
 0x39a   : > { %v3223_v60 = vpop.f32.mrb[11].mxu1 }
 0x39b   : > { %v2631_v61 = vadd.f32 %v3221_v58, %v3169_v56  ;;  %v3224_v62 = vadd.f32 %v3223_v60, %v3222_v59 }
 0x39d   : > { %v2634_v63 = vadd.f32 %v3224_v62, %v3169_v56  ;;  %v2637_v0 = vmax.f32 %v2631_v61, 0.0 }
 0x39f   : > { %v2638_v1 = vmax.f32 %v2634_v63, 0.0 }
 0x3a1   : > { %v2639_v4 = vpack.c.bf16 %v2638_v1, %v2637_v0 }
 0x3a3   : > { %3256 = vmatmul.mubr.bf16.vlgmr.msra.gmra.mrb[12].mxu1 %v2639_v4 }
 0x3a4   : > { %3260 = vmatpush3.bf16.msra.mxu1 %v3737_v3  ;;  %3267 = vmatprep.mubr.msk.bf16.mxu1 %vm3751_vm1, %v3750_v34 }
 0x3a5   : > { %3261 = vmatprep.subr.bf16.mxu1 %v3750_v34 }
 0x3a8   : > { %3262 = vmatpush3.bf16.msra.mxu1 %v3738_v5 }
 0x3a9   : > { %3263 = vmatprep.subr.bf16.mxu1 %v3750_v34 }
 0x3ac   : > { %3264 = vmatpush3.bf16.msra.mxu1 %v3739_v6 }
 0x3ad   : > { %3265 = vmatprep.subr.bf16.mxu1 %v3750_v34 }
 0x3b0   : > { %3266 = vmatpush3.bf16.msra.mxu1 %v3740_v7 }
 0x476   : > { %v2745_v9 = vpop.f32.mrb[12].mxu1 }
 0x477   : > { %v2746_v10 = vadd.f32 %v3186_v8, %v2745_v9  ;;  %v3257_v11 = vpop.f32.mrb[13].mxu1 }
 0x478   : > { %v2748_v12 = vpop.f32.mrb[14].mxu1 }
 0x479   : > { %v2749_v13 = vadd.f32 %v3186_v8, %v2748_v12  ;;  %v3258_v15 = vpop.f32.mrb[15].mxu1  ;;  %v2752_v16 = vmax.f32 %v2746_v10, 0.0 }
 0x47b   : > { %v2753_v19 = vmax.f32 %v2749_v13, 0.0 }
 0x47d   : > { %v2754_v21 = vpack.c.bf16 %v2753_v19, %v2752_v16 }
 0x47f   : > { %3268 = vmatmul.mubr.msk.bf16.vlgmr.msra.gmra.mrb[16].mxu1 %vm2794_vm2, %v2754_v21 }
 0x552   : > { %v2832_v23 = vpop.f32.mrb[16].mxu1 }
 0x553   : > { %v2833_v24 = vadd.f32 %v3195_v22, %v2832_v23  ;;  %v3269_v25 = vpop.f32.mrb[17].mxu1 }
 0x554   : > { %v2835_v26 = vpop.f32.mrb[18].mxu1 }
 0x555   : > { %2840 = vst.msk [vmem:[%s391_s23] sm:$0xff] %vm2839_vm3, %v2833_v24  ;;  %v2836_v27 = vadd.f32 %v3195_v22, %v2835_v26  ;;  %v3270_v28 = vpop.f32.mrb[19].mxu1 }
 0x557   : > { %2841 = vst.msk [vmem:[%s391_s23 + $0x8] sm:$0xff] %vm2839_vm3, %v2836_v27 }
 0x558 PF: > { %s21_s17 = sadd.s32 1, %s3747_s17  }
 0x559   : > { %p18_p4 = scmp.ge.s32.totalorder %s21_s17, 4  }
 0x55b   :  { %20 = sbr.rel (!%p18_p4) target bundleno = 1 (0x1), region = 94 }

</bundles_post_ra>
